<compile_context>
chip_gen: v7x
topology: tpu7x:2x2x1
jax: 0.10.0
libtpu: 0.0.40
codegen_flags: <defaults>
</compile_context>

<pallas_src>
import functools

import jax
import jax.numpy as jnp
from jax.experimental import pallas as pl
from jax.experimental.pallas import tpu as pltpu


# -----------------------------------------------------------------------------
# Pallas kernel: fused (main + evm) MLP forward for one tile of points.
# Feature axis on sublanes, points axis on lanes.
# -----------------------------------------------------------------------------
def _pinn_fused_kernel(
    xy_ref,                 # (2, TN)  f32, row 0 = x, row 1 = y
    w1_ref, b1_ref,         # (2H, 2), (2H, 1)   compute dtype
    w2_ref, b2_ref,         # (2H, 2H) block-diagonal, (2H, 1)
    w3_ref, b3_ref,         # (4, 2H)  zero cross blocks, (4, 1) f32
    out_ref,                # (4, TN)  f32, rows [u, v, p, evm]
):
    cdt = w2_ref.dtype                               # compute dtype (f32 or bf16)
    xy = xy_ref[...].astype(cdt)                     # (2, TN)
    x_row = xy[0:1, :]                               # (1, TN)
    y_row = xy[1:2, :]                               # (1, TN)
    w1 = w1_ref[...]                                 # (2H, 2)

    # ---- layer 1 (in_features = 2): VPU broadcast FMAs, no MXU push --------
    h = jnp.tanh(w1[:, 0:1] * x_row + w1[:, 1:2] * y_row + b1_ref[...])   # (2H, TN)

    # ---- layer 2: block-diagonal (2H, 2H) MXU matmul, f32 accumulate --------
    z2 = jnp.dot(w2_ref[...], h, preferred_element_type=jnp.float32)
    h = jnp.tanh(z2.astype(cdt) + b2_ref[...])                            # (2H, TN)

    # ---- layer 3: (4, 2H) @ (2H, TN) -> [u, v, p, evm] rows -----------------
    out = jnp.dot(w3_ref[...], h, preferred_element_type=jnp.float32) + b3_ref[...]

    out_ref[...] = out.astype(out_ref.dtype)         # single lane-dense store


# -----------------------------------------------------------------------------
# Parameter setup (PyTorch nn.Linear layout: weight = (out_features, in_features)).
# -----------------------------------------------------------------------------
def init_params(key, layer_size=32):
    """Deterministic Glorot-style init for both MLPs (main + evm)."""

    def dense(k, fan_in, fan_out):
        scale = jnp.sqrt(6.0 / (fan_in + fan_out)).astype(jnp.float32)
        w = jax.random.uniform(
            k, (fan_out, fan_in), jnp.float32, minval=-scale, maxval=scale
        )
        b = jnp.zeros((fan_out,), jnp.float32)
        return w, b

    keys = jax.random.split(key, 6)
    H = layer_size
    p = {}
    # main net: 2 -> H -> H -> 3
    p["w1m"], p["b1m"] = dense(keys[0], 2, H)
    p["w2m"], p["b2m"] = dense(keys[1], H, H)
    p["w3m"], p["b3m"] = dense(keys[2], H, 3)
    # evm net: 2 -> H -> H -> 1
    p["w1e"], p["b1e"] = dense(keys[3], 2, H)
    p["w2e"], p["b2e"] = dense(keys[4], H, H)
    p["w3e"], p["b3e"] = dense(keys[5], H, 1)
    return p


def fuse_params(p):
    """Stack main + evm nets into one block-diagonal chain (feature-major)."""
    H = p["w1m"].shape[0]
    f32 = jnp.float32

    w1 = jnp.concatenate([p["w1m"], p["w1e"]], axis=0)                 # (2H, 2)
    b1 = jnp.concatenate([p["b1m"], p["b1e"]])[:, None]                # (2H, 1)

    zHH = jnp.zeros((H, H), f32)
    w2 = jnp.concatenate(
        [
            jnp.concatenate([p["w2m"], zHH], axis=1),
            jnp.concatenate([zHH, p["w2e"]], axis=1),
        ],
        axis=0,
    )                                                                  # (2H, 2H)
    b2 = jnp.concatenate([p["b2m"], p["b2e"]])[:, None]                # (2H, 1)

    w3 = jnp.concatenate(
        [
            jnp.concatenate([p["w3m"], jnp.zeros((3, H), f32)], axis=1),
            jnp.concatenate([jnp.zeros((1, H), f32), p["w3e"]], axis=1),
        ],
        axis=0,
    )                                                                  # (4, 2H)
    b3 = jnp.concatenate([p["b3m"], p["b3e"]])[:, None]                # (4, 1)

    return w1, b1, w2, b2, w3, b3


def pick_compute_dtype():
    """bf16 activations on v6e/v7x (native bf16 EUP/VPU/MXU); f32 elsewhere."""
    try:
        kind = jax.devices()[0].device_kind.lower()
    except Exception:
        return jnp.float32
    if "v6" in kind or "v7" in kind:
        return jnp.bfloat16
    return jnp.float32          # v5e/v5p: no bf16 EUP/VPU -> keep tanh path f32


def prepare_fused_params(params, compute_dtype=jnp.float32):
    """Fuse + cast ONCE (outside the jitted forward); b3 stays f32 (adds onto
    the f32 output accumulators)."""
    w1, b1, w2, b2, w3, b3 = fuse_params(params)
    c = lambda a: a.astype(compute_dtype)
    return (c(w1), c(b1), c(w2), c(b2), c(w3), b3.astype(jnp.float32))


def _round_up(v, m):
    return (v + m - 1) // m * m


def _choose_tile(n, tile_n):
    """128-aligned tile; capped so the grid has >= 2 blocks when N allows
    (keeps both v7x TensorCores busy; harmless on v5e/v6e)."""
    tile = max(128, (int(tile_n) // 128) * 128)
    two_core_tile = _round_up(pl.cdiv(n, 2), 128)
    return max(128, min(tile, two_core_tile))


# -----------------------------------------------------------------------------
# Wrapper: pallas_call plumbing.  Returns the lane-dense (4, N) output slab
# with rows [u, v, p, evm]; downstream losses should index rows directly.
# -----------------------------------------------------------------------------
@functools.partial(jax.jit, static_argnames=("tile_n",))
def pinn_forward(x, y, fused, tile_n=8192):
    """
    Forward pass of CombinedPhysicsNeMoNet.

    x, y  : (N, 1) float32 point coordinates.
    fused : output of prepare_fused_params().
    Returns a (4, N) float32 slab, rows [u, v, p, evm].
    """
    N = x.shape[0]
    tile = _choose_tile(N, tile_n)
    grid = (pl.cdiv(N, tile),)          # ragged last block; no jnp.pad copy

    # Feature-major input slab: (2, N), row 0 = x, row 1 = y (contiguous DMA).
    xy = jnp.concatenate(
        [x.reshape(1, N), y.reshape(1, N)], axis=0
    ).astype(jnp.float32)

    def weight_spec(p):
        return pl.BlockSpec(p.shape, lambda i: (0, 0))

    out = pl.pallas_call(
        _pinn_fused_kernel,
        out_shape=jax.ShapeDtypeStruct((4, N), jnp.float32),
        grid_spec=pltpu.PrefetchScalarGridSpec(
            num_scalar_prefetch=0,
            grid=grid,
            in_specs=[pl.BlockSpec((2, tile), lambda i: (0, i))]
            + [weight_spec(p) for p in fused],
            out_specs=pl.BlockSpec((4, tile), lambda i: (0, i)),
        ),
        compiler_params=pltpu.CompilerParams(
            dimension_semantics=("parallel",),
        ),
    )(xy, *fused)
    return out


def slab_to_dict(slab):
    """API-parity helper (dict of (N,1) arrays like the PyTorch module).
    Costs extra HBM copies — keep off the hot path; index slab rows instead."""
    N = slab.shape[1]
    names = ("u", "v", "p", "evm")
    return {k: slab[i].reshape(N, 1) for i, k in enumerate(names)}


# -----------------------------------------------------------------------------
# Pure-JAX reference (un-fused, points-major, f32) for validation.
# -----------------------------------------------------------------------------
def pinn_forward_ref(x, y, p):
    xy = jnp.concatenate([x, y], axis=1).astype(jnp.float32)      # (N, 2)
    h = jnp.tanh(xy @ p["w1m"].T + p["b1m"])
    h = jnp.tanh(h @ p["w2m"].T + p["b2m"])
    uvp = h @ p["w3m"].T + p["b3m"]
    g = jnp.tanh(xy @ p["w1e"].T + p["b1e"])
    g = jnp.tanh(g @ p["w2e"].T + p["b2e"])
    evm = g @ p["w3e"].T + p["b3e"]
    return jnp.concatenate([uvp, evm], axis=1).T                  # (4, N)


if __name__ == "__main__":
    key = jax.random.PRNGKey(0)
    k_param, k_x, k_y = jax.random.split(key, 3)

    N = 2000         # non-multiple of 128 / tile -> exercises ragged edge block
    layer_size = 32  # cfg.main_net.layer_size / cfg.evm_net.layer_size
    params = init_params(k_param, layer_size=layer_size)

    compute_dtype = pick_compute_dtype()
    fused = prepare_fused_params(params, compute_dtype=compute_dtype)

    # batch = {'x': (N,1), 'y': (N,1)} cavity-flow collocation points in [0,1]^2
    x = jax.random.uniform(k_x, (N, 1), jnp.float32)
    y = jax.random.uniform(k_y, (N, 1), jnp.float32)

    # For N=2000: tile=1024, grid=(2,) -> both v7x TensorCores busy.
    slab = pinn_forward(x, y, fused)
    jax.block_until_ready(slab)
    assert slab.shape == (4, N), slab.shape

    ref = pinn_forward_ref(x, y, params)
    tol = 1e-5 if compute_dtype == jnp.float32 else 5e-2   # bf16 activation path
    err = float(jnp.max(jnp.abs(slab - ref)))
    assert err < tol, (err, tol)

    # API-parity dict (off hot path).
    out_dict = slab_to_dict(slab)
    for k in ("u", "v", "p", "evm"):
        assert out_dict[k].shape == (N, 1), (k, out_dict[k].shape)

    # TODO(synk): the .loss() path (autodiff PDE residuals via NavierStokesEVM /
    # EVMConstraint) requires jax.grad around the kernel and is not part of
    # forward(); only the network forward pass is implemented in Pallas.
    print("KERNEL_OK")
</pallas_src>

<mosaic_0001>
module attributes {stable_mosaic.version = 11 : i64} {
  func.func @_pinn_fused_kernel(%arg0: i32, %arg1: memref<2x1024xf32, #tpu.memory_space<vmem>>, %arg2: memref<64x2xf32, #tpu.memory_space<vmem>>, %arg3: memref<64x1xf32, #tpu.memory_space<vmem>>, %arg4: memref<64x64xf32, #tpu.memory_space<vmem>>, %arg5: memref<64x1xf32, #tpu.memory_space<vmem>>, %arg6: memref<4x64xf32, #tpu.memory_space<vmem>>, %arg7: memref<4x1xf32, #tpu.memory_space<vmem>>, %arg8: memref<4x1024xf32, #tpu.memory_space<vmem>>) attributes {dimension_semantics = [#tpu.dimension_semantics<parallel>], iteration_bounds = array<i64: 2>, scalar_prefetch = 0 : i64, scratch_operands = 0 : i64, tpu.core_type = #tpu.core_type<tc>, window_params = [{transform_indices = @transform_0, window_bounds = array<i64: 2, 1024>}, {pipeline_mode = #tpu.pipeline_mode<synchronous>, transform_indices = @transform_1, window_bounds = array<i64: 64, 2>}, {pipeline_mode = #tpu.pipeline_mode<synchronous>, transform_indices = @transform_2, window_bounds = array<i64: 64, 1>}, {pipeline_mode = #tpu.pipeline_mode<synchronous>, transform_indices = @transform_3, window_bounds = array<i64: 64, 64>}, {pipeline_mode = #tpu.pipeline_mode<synchronous>, transform_indices = @transform_4, window_bounds = array<i64: 64, 1>}, {pipeline_mode = #tpu.pipeline_mode<synchronous>, transform_indices = @transform_5, window_bounds = array<i64: 4, 64>}, {pipeline_mode = #tpu.pipeline_mode<synchronous>, transform_indices = @transform_6, window_bounds = array<i64: 4, 1>}, {transform_indices = @transform_7, window_bounds = array<i64: 4, 1024>}]} {
    %c0 = arith.constant 0 : index
    %c0_0 = arith.constant 0 : index
    %0 = vector.load %arg1[%c0, %c0_0] : memref<2x1024xf32, #tpu.memory_space<vmem>>, vector<2x1024xf32>
    %1 = vector.extract_strided_slice %0 {offsets = [0, 0], sizes = [1, 1024], strides = [1, 1]} : vector<2x1024xf32> to vector<1x1024xf32>
    %2 = vector.extract_strided_slice %0 {offsets = [1, 0], sizes = [1, 1024], strides = [1, 1]} : vector<2x1024xf32> to vector<1x1024xf32>
    %c0_1 = arith.constant 0 : index
    %c0_2 = arith.constant 0 : index
    %3 = vector.load %arg2[%c0_1, %c0_2] : memref<64x2xf32, #tpu.memory_space<vmem>>, vector<64x2xf32>
    %4 = vector.extract_strided_slice %3 {offsets = [0, 0], sizes = [64, 1], strides = [1, 1]} : vector<64x2xf32> to vector<64x1xf32>
    %5 = vector.broadcast %4 : vector<64x1xf32> to vector<64x1024xf32>
    %6 = vector.broadcast %1 : vector<1x1024xf32> to vector<64x1024xf32>
    %7 = arith.mulf %5, %6 : vector<64x1024xf32>
    %8 = vector.extract_strided_slice %3 {offsets = [0, 1], sizes = [64, 1], strides = [1, 1]} : vector<64x2xf32> to vector<64x1xf32>
    %9 = vector.broadcast %8 : vector<64x1xf32> to vector<64x1024xf32>
    %10 = vector.broadcast %2 : vector<1x1024xf32> to vector<64x1024xf32>
    %11 = arith.mulf %9, %10 : vector<64x1024xf32>
    %12 = arith.addf %7, %11 : vector<64x1024xf32>
    %c0_3 = arith.constant 0 : index
    %c0_4 = arith.constant 0 : index
    %13 = vector.load %arg3[%c0_3, %c0_4] : memref<64x1xf32, #tpu.memory_space<vmem>>, vector<64x1xf32>
    %14 = vector.broadcast %13 : vector<64x1xf32> to vector<64x1024xf32>
    %15 = arith.addf %12, %14 : vector<64x1024xf32>
    %16 = math.tanh %15 : vector<64x1024xf32>
    %c0_5 = arith.constant 0 : index
    %c0_6 = arith.constant 0 : index
    %17 = vector.load %arg4[%c0_5, %c0_6] : memref<64x64xf32, #tpu.memory_space<vmem>>, vector<64x64xf32>
    %cst = arith.constant dense<0.000000e+00> : vector<64x1024xf32>
    %18 = tpu.matmul %17, %16, %cst {dimension_numbers = #tpu.dot_dimension_numbers<[1], [0], [0], [1], [0, 0, 1, 1], [], []>} : vector<64x64xf32>, vector<64x1024xf32>, vector<64x1024xf32> -> vector<64x1024xf32>
    %c0_7 = arith.constant 0 : index
    %c0_8 = arith.constant 0 : index
    %19 = vector.load %arg5[%c0_7, %c0_8] : memref<64x1xf32, #tpu.memory_space<vmem>>, vector<64x1xf32>
    %20 = vector.broadcast %19 : vector<64x1xf32> to vector<64x1024xf32>
    %21 = arith.addf %18, %20 : vector<64x1024xf32>
    %22 = math.tanh %21 : vector<64x1024xf32>
    %c0_9 = arith.constant 0 : index
    %c0_10 = arith.constant 0 : index
    %23 = vector.load %arg6[%c0_9, %c0_10] : memref<4x64xf32, #tpu.memory_space<vmem>>, vector<4x64xf32>
    %cst_11 = arith.constant dense<0.000000e+00> : vector<4x1024xf32>
    %24 = tpu.matmul %23, %22, %cst_11 {dimension_numbers = #tpu.dot_dimension_numbers<[1], [0], [0], [1], [0, 0, 1, 1], [], []>} : vector<4x64xf32>, vector<64x1024xf32>, vector<4x1024xf32> -> vector<4x1024xf32>
    %c0_12 = arith.constant 0 : index
    %c0_13 = arith.constant 0 : index
    %25 = vector.load %arg7[%c0_12, %c0_13] : memref<4x1xf32, #tpu.memory_space<vmem>>, vector<4x1xf32>
    %26 = vector.broadcast %25 : vector<4x1xf32> to vector<4x1024xf32>
    %27 = arith.addf %24, %26 : vector<4x1024xf32>
    %c0_14 = arith.constant 0 : index
    %c0_15 = arith.constant 0 : index
    %28 = vector.load %arg8[%c0_14, %c0_15] : memref<4x1024xf32, #tpu.memory_space<vmem>>, vector<4x1024xf32>
    tpu.vector_store %arg8[%c0_14, %c0_15], %27 {strides = array<i32>} : memref<4x1024xf32, #tpu.memory_space<vmem>>, vector<4x1024xf32>,
    return
  }
  func.func @transform_0(%arg0: i32) -> (i32, i32) {
    %c0_i32 = arith.constant 0 : i32
    %c0_i32_0 = arith.constant 0 : i32
    return %c0_i32, %arg0 : i32, i32
  }
  func.func @transform_1(%arg0: i32) -> (i32, i32) {
    %c0_i32 = arith.constant 0 : i32
    %c0_i32_0 = arith.constant 0 : i32
    %c0_i32_1 = arith.constant 0 : i32
    return %c0_i32, %c0_i32_0 : i32, i32
  }
  func.func @transform_2(%arg0: i32) -> (i32, i32) {
    %c0_i32 = arith.constant 0 : i32
    %c0_i32_0 = arith.constant 0 : i32
    %c0_i32_1 = arith.constant 0 : i32
    return %c0_i32, %c0_i32_0 : i32, i32
  }
  func.func @transform_3(%arg0: i32) -> (i32, i32) {
    %c0_i32 = arith.constant 0 : i32
    %c0_i32_0 = arith.constant 0 : i32
    %c0_i32_1 = arith.constant 0 : i32
    return %c0_i32, %c0_i32_0 : i32, i32
  }
  func.func @transform_4(%arg0: i32) -> (i32, i32) {
    %c0_i32 = arith.constant 0 : i32
    %c0_i32_0 = arith.constant 0 : i32
    %c0_i32_1 = arith.constant 0 : i32
    return %c0_i32, %c0_i32_0 : i32, i32
  }
  func.func @transform_5(%arg0: i32) -> (i32, i32) {
    %c0_i32 = arith.constant 0 : i32
    %c0_i32_0 = arith.constant 0 : i32
    %c0_i32_1 = arith.constant 0 : i32
    return %c0_i32, %c0_i32_0 : i32, i32
  }
  func.func @transform_6(%arg0: i32) -> (i32, i32) {
    %c0_i32 = arith.constant 0 : i32
    %c0_i32_0 = arith.constant 0 : i32
    %c0_i32_1 = arith.constant 0 : i32
    return %c0_i32, %c0_i32_0 : i32, i32
  }
  func.func @transform_7(%arg0: i32) -> (i32, i32) {
    %c0_i32 = arith.constant 0 : i32
    %c0_i32_0 = arith.constant 0 : i32
    return %c0_i32, %arg0 : i32, i32
  }
}

</mosaic_0001>

<bundles_post_ra>
// kernel: pinn_forward.1
= control target key start
LH: loop header
LB: loop body
LE: loop exit
PB: predicated region body
PF: predicated region fallthrough
CT: control target
= control target key end

     0   :  { %12 = vsyncpa [#allocation3], 0  ;;  %s3394_s0 = inlined_call_operand.vmem [shape: f32[2,2000], index: 0, kind: input, shape index: {}]   ;;  %s3395_s1 = inlined_call_operand.vmem [shape: f32[64,2], index: 1, kind: input, shape index: {}]   ;;  %s3396_s2 = inlined_call_operand.vmem [shape: f32[64,1], index: 2, kind: input, shape index: {}]   ;;  %s3397_s3 = inlined_call_operand.vmem [shape: f32[64,64], index: 3, kind: input, shape index: {}]   ;;  %s3398_s4 = inlined_call_operand.vmem [shape: f32[64,1], index: 4, kind: input, shape index: {}]   ;;  %s3399_s5 = inlined_call_operand.vmem [shape: f32[4,64], index: 5, kind: input, shape index: {}]   ;;  %s3400_s6 = inlined_call_operand.vmem [shape: f32[4,1], index: 6, kind: input, shape index: {}]   ;;  %s3401_s7 = inlined_call_operand.hbm [shape: f32[4,2000], index: 7, kind: output, shape index: {}]  }
   0x1   :  { %14 = vsyncpa [#allocation3 + $0x1], 0  ;;  %s2454_s24 = smov 0   ;;  %s2456_s25 = smov 0  }
   0x2   :  { %s2458_s26 = smov 0   ;;  %s2460_s27 = smov 0  }
   0x3 LB: > { %s2475_s28 = sadd.s32 4294967295, %s2408_s27   ;;  %s1861_s29 = sadd.s32 4294967294, %s2408_s27   ;;  %s2408_s27 = sphi %s2460_s27, %s3494_s27   ;;  %s2404_s26 = sphi %s2458_s26, %s3493_s26   ;;  %s2400_s25 = sphi %s2456_s25, %s3492_s25   ;;  %s2396_s24 = sphi %s2454_s24, %s3491_s24  }
   0x4   : > { %s2479_s30 = sadd.s32 1, %s2408_s27   ;;  %s179_s8 = sadd.s32 1, %s2404_s26 }
   0x5   : > { %s176_s9 = ssub.s32 %s2408_s27, %s2479_s30  ;;  %p189_p0 = scmp.ne.s32.totalorder %s2404_s26, %s2400_s25 }
   0x6   : > { %p177_p1 = scmp.eq.s32.totalorder %s176_s9, 0  ;;  %p190_p2 = scmp.eq.s32.totalorder %s2475_s28, 1 }
   0x7   : > { %p195_p3 = scmp.ne.s32.totalorder %s2400_s25, %s2396_s24  ;;  %p196_p4 = scmp.eq.s32.totalorder %s1861_s29, 1 }
   0x8   : > { %s2490_s10 = scalar_select %p177_p1, %s2404_s26, %s179_s8  }
   0x9   : > { %p2492_p5 = por %p190_p2, %p189_p0  ;;  %p2496_p6 = por %p196_p4, %p195_p3 }
   0xa   : > { %p1864_p7 = scmp.ge.s32.totalorder %s2408_s27, 1  ;;  %p241_p8 = scmp.lt.s32.totalorder %s2408_s27, 3 }
   0xc   : > { %p242_p9 = pnand %p1864_p7, %p241_p8 }
   0xe   : > { %245 = sbr.rel (%p242_p9) target bundleno = 759 (0x2f7), region = 48 }
  0x15   : > { %v284_v0 = vld [vmem:[%s3395_s1 + $0x10] sm:$0xff]  ;;  %v282_v1 = vld [vmem:[%s3395_s1] sm:$0xff]  ;;  %v2410_v2 = vmov 1   ;;  %v283_v4 = vld [vmem:[%s3395_s1 + $0x8] sm:$0xff]  ;;  %v2411_v7 = vmov 0   ;;  %v3402_v27 = vmov 0.0   ;;  %v332_v28 = vlaneseq }
  0x16   : > { %2082 = vset.pattern.permute.xlu0 %v2410_v2  ;;  %2080 = vset.pattern.permute.xlu1 %v2410_v2  ;;  %v286_v3 = vld [vmem:[%s3395_s1 + $0x20] sm:$0xff]  ;;  %v288_v5 = vld [vmem:[%s3395_s1 + $0x30] sm:$0xff]  ;;  %v285_v6 = vld [vmem:[%s3395_s1 + $0x18] sm:$0xff]  ;;  %s1866_s21 = sshll.u32 %s2475_s28, 3  ;;  %vm932_vm0 = vcmask 523264   ;;  %s270_s16 = sand.u32 1, %s2400_s25  }
  0x17   : > { %477 = vperm.xlu0 %2082, %v284_v0   ;;  %469 = vperm.xlu1 %2080, %v282_v1   ;;  %v700_v8 = vld [vmem:[%s3396_s2] sm:$0xff]  ;;  %v701_v9 = vld [vmem:[%s3396_s2 + $0x8] sm:$0xff]  ;;  %v703_v11 = vld [vmem:[%s3396_s2 + $0x18] sm:$0xff]  ;;  %p274_p10 = scmp.lt.s32.totalorder %s1866_s21, 15  ;;  %v333_v29 = vshrl.u32 %v332_v28, 7  ;;  %s1865_s17 = sshll.u32 %s270_s16, 5 }
  0x18   : > { %v287_v10 = vld [vmem:[%s3395_s1 + $0x28] sm:$0xff]  ;;  %v884_v13 = vld [vmem:[%s3398_s4] sm:$0xff]  ;;  %v702_v14 = vld [vmem:[%s3396_s2 + $0x10] sm:$0xff]  ;;  %1021 = vmatprep.mubr.f32.mxu0 %v3402_v27  ;;  %1134 = vmatprep.mubr.f32.mxu1 %v3402_v27  ;;  %s272_s18 = scalar_lea.vmem [#allocation2], %s1865_s17  ;;  %s1909_s19 = sshll.u32 %s2475_s28, 9 }
  0x19   : > { %v705_v12 = vld [vmem:[%s3396_s2 + $0x28] sm:$0xff]  ;;  %v886_v15 = vld [vmem:[%s3398_s4 + $0x10] sm:$0xff]  ;;  %v888_v16 = vld [vmem:[%s3398_s4 + $0x20] sm:$0xff]  ;;  %s3496_s21 = smov (!%p274_p10, %s1866_s21), 15  ;;  %v502_v30 = vsub.s32 1, %v333_v29  ;;  %v510_v31 = vsub.s32 5, %v333_v29  ;;  %s3350_s23 = scalar_lea.hbm %s3401_s7, %s1909_s19 }
  0x1a   : > { %v289_v17 = vld [vmem:[%s3395_s1 + $0x38] sm:$0xff]  ;;  %v890_v18 = vld [vmem:[%s3398_s4 + $0x30] sm:$0xff]  ;;  %v1474_v19 = vld [vmem:[%s3400_s6] sm:$0xf]  ;;  %s1867_s22 = sshll.u32 %s3496_s21, 1  ;;  %v334_v32 = vsub.s32 0, %v333_v29 }
  0x1b   : > { %485 = vperm.xlu0 %2082, %v286_v3   ;;  %473 = vperm.xlu1 %2080, %v283_v4   ;;  %v704_v20 = vld [vmem:[%s3396_s2 + $0x20] sm:$0xff]  ;;  %v706_v21 = vld [vmem:[%s3396_s2 + $0x30] sm:$0xff]  ;;  %v707_v22 = vld [vmem:[%s3396_s2 + $0x38] sm:$0xff]  ;;  %s277_s8 = scalar_lea.vmem %s3394_s0, %s1867_s22  ;;  %v342_v33 = vsub.s32 4, %v333_v29  ;;  %v506_v35 = vsub.s32 3, %v333_v29  ;;  %v514_v36 = vsub.s32 7, %v333_v29 }
  0x1c   : > { %v885_v23 = vld [vmem:[%s3398_s4 + $0x8] sm:$0xff]  ;;  %v887_v24 = vld [vmem:[%s3398_s4 + $0x18] sm:$0xff]  ;;  %v280_v37 = vld [vmem:[%s277_s8] sm:$0xff]  ;;  %v338_v38 = vsub.s32 2, %v333_v29  ;;  %v346_v39 = vsub.s32 6, %v333_v29  ;;  %s1802_s20 = sshll.u32 %s272_s18, 4  ;;  %s3352_s20 = int_to_ptr.vmem [resolvable:$true] %s1802_s20 }
  0x1d   : > { %v889_v25 = vld [vmem:[%s3398_s4 + $0x28] sm:$0xff]  ;;  %v891_v26 = vld [vmem:[%s3398_s4 + $0x38] sm:$0xff]  ;;  %v507_v44 = vrot.slane %v280_v37, %v506_v35  ;;  %v515_v45 = vrot.slane %v280_v37, %v514_v36  ;;  %v503_v46 = vrot.slane %v280_v37, %v502_v30  ;;  %v511_v47 = vrot.slane %v280_v37, %v510_v31  ;;  %s1788_s29 = scalar_lea.sflag [#allocation3], %s270_s16  ;;  %s2413_s28 = smov [#allocation2]  }
  0x1e   : > { %v281_v34 = vld [vmem:[%s277_s8 + $0x8] sm:$0xff]  ;;  %v339_v50 = vrot.slane %v280_v37, %v338_v38  ;;  %v347_v51 = vrot.slane %v280_v37, %v346_v39  ;;  %v335_v52 = vrot.slane %v280_v37, %v334_v32  ;;  %v343_v53 = vrot.slane %v280_v37, %v342_v33  ;;  %s2346_s8 = scalar_lea.vmem %s3352_s20, 512  ;;  %s2350_s9 = sshll.u32 %s2413_s28, 4  ;;  %s2351_s9 = int_to_ptr.vmem [resolvable:$false] %s2350_s9 }
  0x1f   : > { %493 = vperm.xlu0 %2082, %v288_v5   ;;  %2081 = vset.pattern.permute.xlu1 %v2411_v7  ;;  %v519_v40 = vrot.slane %v281_v34, %v502_v30  ;;  %v527_v41 = vrot.slane %v281_v34, %v510_v31  ;;  %v351_v42 = vrot.slane %v281_v34, %v334_v32  ;;  %p2347_p11 = scmp.ne.s32.totalorder %s3352_s20, %s2346_s8  ;;  %s2352_s13 = scalar_lea.vmem %s2351_s9, 1024 }
  0x20   : > { %307 = vperm.xlu1 %2081, %v285_v6   ;;  %v359_v43 = vrot.slane %v281_v34, %v342_v33  ;;  %v355_v54 = vrot.slane %v281_v34, %v338_v38  ;;  %v523_v55 = vrot.slane %v281_v34, %v506_v35  ;;  %v363_v56 = vrot.slane %v281_v34, %v346_v39  ;;  %p2353_p0 = scmp.lt.s32.totalorder %s3352_s20, %s2351_s9  ;;  %p2354_p1 = scmp.lt.s32.totalorder %s2352_s13, %s2346_s8 }
  0x21   : > { %v531_v57 = vrot.slane %v281_v34, %v514_v36  ;;  %v2583_v58 = vrot.slane %v519_v40, %v502_v30  ;;  %v2585_v59 = vrot.slane %v527_v41, %v502_v30  ;;  %v2587_v60 = vrot.slane %v351_v42, %v334_v32  ;;  %p2348_p12 = pnand %p2347_p11, %p2492_p5 }
  0x22   : > { %v2589_v61 = vrot.slane %v359_v43, %v334_v32  ;;  %v2591_v62 = vrot.slane %v507_v44, %v502_v30  ;;  %v2593_v63 = vrot.slane %v515_v45, %v502_v30  ;;  %p2355_p2 = por %p2354_p1, %p2353_p0 }
  0x23   : > { %2087 = vset.pattern.permute.xlu0 %v2411_v7  ;;  %p2349_p13 = pneg %p2348_p12 }
  0x24   : > { %292 = vperm.xlu0 %2087, %v282_v1   ;;  %2083 = vset.pattern.permute.xlu1 %v2410_v2  ;;  %v2597_v1 = vrot.slane %v511_v47, %v502_v30 }
  0x25   : > { %481 = vperm.xlu1 %2083, %v285_v6   ;;  %v2603_v6 = vrot.slane %v335_v52, %v334_v32  ;;  %p2356_p3 = pnand %p2355_p2, %p2349_p13 }
  0x28   : > { %297 = vperm.xlu0 %2087, %v283_v4   ;;  %v2599_v4 = vrot.slane %v339_v50, %v334_v32 }
  0x29   : > { %2084 = vset.pattern.permute.xlu1 %v2411_v7 }
  0x2a   : > { %710 = vperm.xlu1 %2084, %v700_v8   ;;  %v2607_v8 = vrot.slane %v355_v54, %v334_v32 }
  0x2c   : > { %302 = vperm.xlu0 %2087, %v284_v0   ;;  %v2595_v0 = vrot.slane %v503_v46, %v502_v30 }
  0x2e   : > { %312 = vperm.xlu1 %2084, %v286_v3  }
  0x30   : > { %715 = vperm.xlu0 %2087, %v701_v9   ;;  %v2609_v9 = vrot.slane %v523_v55, %v502_v30 }
  0x32   : > { %317 = vperm.xlu1 %2084, %v287_v10   ;;  %3418 = vst [vmem:[#allocation5_spill] sm:$0xff] %v2609_v9 }
  0x34   : > { %725 = vperm.xlu0 %2087, %v703_v11   ;;  %v2613_v11 = vrot.slane %v531_v57, %v502_v30 }
  0x36   : > { %2085 = vset.pattern.permute.xlu1 %v2410_v2  ;;  %3419 = vst [vmem:[#allocation6_spill] sm:$0xff] %v2613_v11 }
  0x37   : > { %489 = vperm.xlu1 %2085, %v287_v10   ;;  %v2611_v10 = vrot.slane %v363_v56, %v334_v32 }
  0x38   : > { %735 = vperm.xlu0 %2087, %v705_v12  }
  0x3b   : > { %2086 = vset.pattern.permute.xlu1 %v2411_v7 }
  0x3c   : > { %894 = vperm.xlu0 %2087, %v884_v13   ;;  %720 = vperm.xlu1 %2086, %v702_v14  }
  0x40   : > { %904 = vperm.xlu0 %2087, %v886_v15   ;;  %322 = vperm.xlu1 %2086, %v288_v5   ;;  %v2601_v5 = vrot.slane %v347_v51, %v334_v32 }
  0x44   : > { %914 = vperm.xlu0 %2087, %v888_v16   ;;  %327 = vperm.xlu1 %2086, %v289_v17  }
  0x48   : > { %924 = vperm.xlu0 %2087, %v890_v18   ;;  %2088 = vset.pattern.permute.xlu1 %v2410_v2 }
  0x49   : > { %497 = vperm.xlu1 %2088, %v289_v17  }
  0x4c   : > { %1477 = vperm.xlu0 %2087, %v1474_v19  }
  0x4d   : > { %2089 = vset.pattern.permute.xlu1 %v2411_v7  ;;  %v2605_v7 = vrot.slane %v343_v53, %v334_v32 }
  0x4e   : > { %730 = vperm.xlu1 %2089, %v704_v20  }
  0x52   : > { %740 = vperm.xlu1 %2089, %v706_v21  }
  0x56   : > { %745 = vperm.xlu1 %2089, %v707_v22  }
  0x5a   : > { %899 = vperm.xlu1 %2089, %v885_v23  }
  0x5e   : > { %909 = vperm.xlu1 %2089, %v887_v24  }
  0x62   : > { %919 = vperm.xlu1 %2089, %v889_v25  }
  0x66   : > { %929 = vperm.xlu1 %2089, %v891_v26  }
  0x96   : > { %v470_v48 = vpop.permute.xlu1 %469  ;;  %v478_v49 = vpop.permute.xlu0 %477 }
  0x97   : > { %v2616_v12 = vmul.f32 %v2583_v58, %v470_v48  ;;  %v2619_v13 = vmul.f32 %v2585_v59, %v470_v48  ;;  %v2622_v14 = vmul.f32 %v2583_v58, %v478_v49  ;;  %v2625_v15 = vmul.f32 %v2585_v59, %v478_v49 }
  0x98   : > { %v573_v16 = vmul.f32 %v2591_v62, %v470_v48  ;;  %v575_v17 = vmul.f32 %v2593_v63, %v470_v48  ;;  %v572_v18 = vmul.f32 %v2595_v0, %v470_v48  ;;  %v2631_v19 = vmul.f32 %v2597_v1, %v470_v48 }
  0x99   : > { %3420 = vst [vmem:[#allocation7_spill] sm:$0xff] %v2616_v12  ;;  %3421 = vst [vmem:[#allocation8_spill] sm:$0xff] %v2619_v13  ;;  %v2634_v21 = vmul.f32 %v2591_v62, %v478_v49  ;;  %v2637_v22 = vmul.f32 %v2593_v63, %v478_v49  ;;  %v2640_v23 = vmul.f32 %v2595_v0, %v478_v49 }
  0x9a   : > { %v474_v2 = vpop.permute.xlu1 %473  ;;  %v486_v3 = vpop.permute.xlu0 %485  ;;  %3422 = vst [vmem:[#allocation9_spill] sm:$0xff] %v2622_v14  ;;  %3423 = vst [vmem:[#allocation10_spill] sm:$0xff] %v2625_v15  ;;  %v2643_v24 = vmul.f32 %v2597_v1, %v478_v49  ;;  %v2646_v26 = vmul.f32 %v2609_v9, %v470_v48  ;;  %v2649_v28 = vmul.f32 %v2613_v11, %v470_v48 }
  0x9b   : > { %v2652_v29 = vmul.f32 %v2609_v9, %v478_v49  ;;  %v2655_v30 = vmul.f32 %v2613_v11, %v478_v49  ;;  %v2658_v31 = vmul.f32 %v2583_v58, %v474_v2  ;;  %v2661_v32 = vmul.f32 %v2585_v59, %v474_v2 }
  0x9c   : > { %v2664_v33 = vmul.f32 %v2583_v58, %v486_v3  ;;  %v2667_v34 = vmul.f32 %v2585_v59, %v486_v3  ;;  %v581_v35 = vmul.f32 %v2591_v62, %v474_v2  ;;  %v583_v36 = vmul.f32 %v2593_v63, %v474_v2 }
  0x9d   : > { %3424 = vst [vmem:[#allocation11_spill] sm:$0xff] %v2652_v29  ;;  %3425 = vst [vmem:[#allocation12_spill] sm:$0xff] %v2655_v30  ;;  %v580_v37 = vmul.f32 %v2595_v0, %v474_v2  ;;  %v2673_v38 = vmul.f32 %v2597_v1, %v474_v2  ;;  %v2676_v39 = vmul.f32 %v2591_v62, %v486_v3 }
  0x9e   : > { %v494_v20 = vpop.permute.xlu0 %493  ;;  %3426 = vst [vmem:[#allocation13_spill] sm:$0xff] %v2658_v31  ;;  %3427 = vst [vmem:[#allocation14_spill] sm:$0xff] %v2661_v32  ;;  %v2679_v40 = vmul.f32 %v2593_v63, %v486_v3  ;;  %v2682_v41 = vmul.f32 %v2595_v0, %v486_v3  ;;  %v2685_v42 = vmul.f32 %v2597_v1, %v486_v3 }
  0x9f   : > { %v308_v25 = vpop.permute.xlu1 %307  ;;  %3428 = vst [vmem:[#allocation15_spill] sm:$0xff] %v2664_v33  ;;  %3429 = vst [vmem:[#allocation16_spill] sm:$0xff] %v2667_v34  ;;  %v2690_v44 = vmul.f32 %v2609_v9, %v474_v2  ;;  %v2693_v45 = vmul.f32 %v2613_v11, %v474_v2  ;;  %v2696_v46 = vmul.f32 %v2609_v9, %v486_v3 }
  0xa0   : > { %v2699_v47 = vmul.f32 %v2613_v11, %v486_v3  ;;  %v2702_v48 = vmul.f32 %v2583_v58, %v494_v20  ;;  %v2705_v49 = vmul.f32 %v2585_v59, %v494_v20  ;;  %v2712_v52 = vmul.f32 %v2591_v62, %v494_v20 }
  0xa1   : > { %3430 = vst [vmem:[#allocation17_spill] sm:$0xff] %v2696_v46  ;;  %v2715_v53 = vmul.f32 %v2587_v60, %v308_v25  ;;  %v2722_v56 = vmul.f32 %v2593_v63, %v494_v20  ;;  %v2725_v57 = vmul.f32 %v2589_v61, %v308_v25  ;;  %v429_v2 = vmul.f32 %v2599_v4, %v308_v25 }
  0xa2   : > { %3431 = vst [vmem:[#allocation18_spill] sm:$0xff] %v2699_v47  ;;  %3432 = vst [vmem:[#allocation19_spill] sm:$0xff] %v2702_v48  ;;  %v431_v3 = vmul.f32 %v2601_v5, %v308_v25  ;;  %v428_v27 = vmul.f32 %v2603_v6, %v308_v25  ;;  %v2735_v34 = vmul.f32 %v2605_v7, %v308_v25 }
  0xa3   : > { %v2687_v43 = vpop.permute.xlu0 %292  ;;  %3433 = vst [vmem:[#allocation20_spill] sm:$0xff] %v2705_v49  ;;  %3435 = vst [vmem:[#allocation22_spill] sm:$0xff] %v2715_v53  ;;  %v2738_v33 = vmul.f32 %v2595_v0, %v494_v20  ;;  %v2741_v47 = vmul.f32 %v2597_v1, %v494_v20  ;;  %v2747_v15 = vmul.f32 %v2611_v10, %v308_v25 }
  0xa4   : > { %v2707_v50 = vpop.permute.xlu1 %481  ;;  %v405_v51 = vmul.f32 %v2599_v4, %v2687_v43  ;;  %v407_v54 = vmul.f32 %v2601_v5, %v2687_v43  ;;  %v404_v55 = vmul.f32 %v2603_v6, %v2687_v43  ;;  %3436 = vst [vmem:[#allocation23_spill] sm:$0xff] %v2725_v57  ;;  %v406_v48 = vmul.f32 %v2605_v7, %v2687_v43 }
  0xa5   : > { %3434 = vst [vmem:[#allocation21_spill] sm:$0xff] %v2707_v50  ;;  %3437 = vst [vmem:[#allocation24_spill] sm:$0xff] %v2741_v47  ;;  %v2744_v57 = vmul.f32 %v2607_v8, %v308_v25  ;;  %v2750_v53 = vmul.f32 %v2609_v9, %v494_v20  ;;  %v2754_v30 = vmul.f32 %v2587_v60, %v2687_v43 }
  0xa6   : > { %v637_v46 = vadd.f32 %v573_v16, %v405_v51  ;;  %3439 = vst [vmem:[#allocation26_spill] sm:$0xff] %v2747_v15  ;;  %v639_v29 = vadd.f32 %v575_v17, %v407_v54  ;;  %v636_v32 = vadd.f32 %v572_v18, %v404_v55  ;;  %v2759_v13 = vmul.f32 %v2613_v11, %v494_v20 }
  0xa7   : > { %v2730_v49 = vpop.permute.xlu0 %297  ;;  %3438 = vst [vmem:[#allocation25_spill] sm:$0xff] %v2744_v57  ;;  %3440 = vst [vmem:[#allocation27_spill] sm:$0xff] %v2750_v53  ;;  %v2770_v15 = vmul.f32 %v2589_v61, %v2687_v43  ;;  %v638_v54 = vadd.f32 %v2631_v19, %v406_v48  ;;  %v2784_v55 = vmul.f32 %v2585_v59, %v2707_v50 }
  0xa8   : > { %3441 = vst [vmem:[#allocation28_spill] sm:$0xff] %v2759_v13  ;;  %v413_v16 = vmul.f32 %v2599_v4, %v2730_v49  ;;  %v415_v51 = vmul.f32 %v2601_v5, %v2730_v49  ;;  %v412_v53 = vmul.f32 %v2603_v6, %v2730_v49  ;;  %v414_v20 = vmul.f32 %v2605_v7, %v2730_v49 }
  0xa9   : > { %v2756_v14 = vpop.permute.xlu1 %710  ;;  %3442 = vst [vmem:[#allocation29_spill] sm:$0xff] %v2770_v15  ;;  %3445 = vst [vmem:[#allocation32_spill] sm:$0xff] %v2784_v55  ;;  %v597_v11 = vmul.f32 %v2591_v62, %v2707_v50  ;;  %v599_v19 = vmul.f32 %v2593_v63, %v2707_v50  ;;  %v596_v48 = vmul.f32 %v2595_v0, %v2707_v50 }
  0xaa   : > { %v749_v25 = vadd.f32 %v2756_v14, %v637_v46  ;;  %v751_v18 = vadd.f32 %v2756_v14, %v639_v29  ;;  %v2780_v46 = vmul.f32 %v2583_v58, %v2707_v50  ;;  %v748_v13 = vadd.f32 %v2756_v14, %v636_v32 }
  0xab   : > { %v2772_v17 = vpop.permute.xlu0 %302  ;;  %v750_v29 = vadd.f32 %v2756_v14, %v638_v54  ;;  %v645_v9 = vadd.f32 %v581_v35, %v413_v16  ;;  %v647_v55 = vadd.f32 %v583_v36, %v415_v51  ;;  %v644_v32 = vadd.f32 %v580_v37, %v412_v53 }
  0xac   : > { %3443 = vst [vmem:[#allocation30_spill] sm:$0xff] %v2772_v17  ;;  %3444 = vst [vmem:[#allocation31_spill] sm:$0xff] %v2780_v46  ;;  %v598_v46 = vmul.f32 %v2597_v1, %v2707_v50  ;;  %2090 = vtanh.f32 %v749_v25  ;;  %v2800_v15 = vmul.f32 %v2587_v60, %v2730_v49  ;;  %v2804_v54 = vmul.f32 %v2589_v61, %v2730_v49 }
  0xad   : > { %v2789_v57 = vpop.permute.xlu1 %312  ;;  %2092 = vtanh.f32 %v751_v18  ;;  %v646_v31 = vadd.f32 %v2673_v38, %v414_v20  ;;  %v661_v16 = vadd.f32 %v597_v11, %v429_v2  ;;  %v663_v25 = vadd.f32 %v599_v19, %v431_v3 }
  0xae   : > { %3446 = vst [vmem:[#allocation33_spill] sm:$0xff] %v2789_v57  ;;  %2094 = vtanh.f32 %v748_v13  ;;  %v421_v51 = vmul.f32 %v2599_v4, %v2772_v17  ;;  %v423_v38 = vmul.f32 %v2601_v5, %v2772_v17  ;;  %v2823_v13 = vmul.f32 %v2587_v60, %v2772_v17 }
  0xaf   : > { %v2806_v47 = vpop.permute.xlu0 %715  ;;  %2096 = vtanh.f32 %v750_v29  ;;  %v2835_v2 = vmul.f32 %v2587_v60, %v2789_v57  ;;  %v660_v3 = vadd.f32 %v596_v48, %v428_v27  ;;  %v437_v18 = vmul.f32 %v2599_v4, %v2789_v57 }
  0xb0   : > { %v757_v12 = vadd.f32 %v2806_v47, %v645_v9  ;;  %v759_v35 = vadd.f32 %v2806_v47, %v647_v55  ;;  %v756_v36 = vadd.f32 %v2806_v47, %v644_v32  ;;  %v758_v53 = vadd.f32 %v2806_v47, %v646_v31  ;;  %3447 = vst [vmem:[#allocation34_spill] sm:$0xff] %v2823_v13 }
  0xb1   : > { %v2812_v37 = vpop.permute.xlu1 %317  ;;  %v420_v9 = vmul.f32 %v2603_v6, %v2772_v17  ;;  %v2827_v31 = vmul.f32 %v2589_v61, %v2772_v17  ;;  %3450 = vst [vmem:[#allocation37_spill] sm:$0xff] %v2835_v2  ;;  %v2841_v20 = vmul.f32 %v2589_v61, %v2789_v57  ;;  %v439_v29 = vmul.f32 %v2601_v5, %v2789_v57 }
  0xb2   : > { %2098 = vtanh.f32 %v757_v12  ;;  %v422_v12 = vmul.f32 %v2605_v7, %v2772_v17  ;;  %v653_v32 = vadd.f32 %v2634_v21, %v421_v51  ;;  %v2863_v21 = vmul.f32 %v2589_v61, %v2812_v37 }
  0xb3   : > { %3448 = vst [vmem:[#allocation35_spill] sm:$0xff] %v2827_v31  ;;  %v2829_v11 = vpop.permute.xlu0 %725  ;;  %2100 = vtanh.f32 %v759_v35  ;;  %3451 = vst [vmem:[#allocation38_spill] sm:$0xff] %v2841_v20  ;;  %v655_v35 = vadd.f32 %v2637_v22, %v423_v38  ;;  %v652_v48 = vadd.f32 %v2640_v23, %v420_v9  ;;  %v2859_v31 = vmul.f32 %v2587_v60, %v2812_v37 }
  0xb4   : > { %3449 = vst [vmem:[#allocation36_spill] sm:$0xff] %v2829_v11  ;;  %2102 = vtanh.f32 %v756_v36  ;;  %v773_v55 = vadd.f32 %v2829_v11, %v661_v16  ;;  %v775_v27 = vadd.f32 %v2829_v11, %v663_v25  ;;  %v772_v36 = vadd.f32 %v2829_v11, %v660_v3  ;;  %3453 = vst [vmem:[#allocation40_spill] sm:$0xff] %v2863_v21 }
  0xb5   : > { %2104 = vtanh.f32 %v758_v53  ;;  %v654_v20 = vadd.f32 %v2643_v24, %v422_v12  ;;  %v662_v53 = vadd.f32 %v598_v46, %v2735_v34  ;;  %3452 = vst [vmem:[#allocation39_spill] sm:$0xff] %v2859_v31  ;;  %v445_v22 = vmul.f32 %v2599_v4, %v2812_v37 }
  0xb6   : > { %v2846_v19 = vpop.permute.xlu1 %489  ;;  %v2091_v2 = vpop.eup %2090  ;;  %v2868_v23 = vadd.f32 %v2676_v39, %v437_v18  ;;  %2106 = vtanh.f32 %v773_v55  ;;  %v447_v46 = vmul.f32 %v2601_v5, %v2812_v37  ;;  %v2874_v25 = vadd.f32 %v2679_v40, %v439_v29 }
  0xb7   : > { %v613_v16 = vmul.f32 %v2591_v62, %v2846_v19  ;;  %v2093_v24 = vpop.eup %2092  ;;  %v774_v34 = vadd.f32 %v2829_v11, %v662_v53  ;;  %2108 = vtanh.f32 %v775_v27  ;;  %v615_v38 = vmul.f32 %v2593_v63, %v2846_v19 }
  0xb8   : > { %v2095_v51 = vpop.eup %2094  ;;  %v436_v9 = vmul.f32 %v2603_v6, %v2789_v57  ;;  %v444_v39 = vmul.f32 %v2603_v6, %v2812_v37  ;;  %2110 = vtanh.f32 %v772_v36  ;;  %v612_v40 = vmul.f32 %v2595_v0, %v2846_v19 }
  0xb9   : > { %v2097_v12 = vpop.eup %2096  ;;  %v677_v18 = vadd.f32 %v613_v16, %v445_v22  ;;  %v438_v55 = vmul.f32 %v2605_v7, %v2789_v57  ;;  %v614_v31 = vmul.f32 %v2597_v1, %v2846_v19  ;;  %2112 = vtanh.f32 %v774_v34 }
  0xba   : > { %v446_v16 = vmul.f32 %v2605_v7, %v2812_v37  ;;  %v679_v50 = vadd.f32 %v615_v38, %v447_v46  ;;  %v417_v34 = vmul.f32 %v2607_v8, %v2730_v49  ;;  %v2907_v46 = vmul.f32 %v2583_v58, %v2846_v19 }
  0xbb   : > { %v2882_v3 = vpop.permute.xlu1 %720  ;;  %v2911_v38 = vmul.f32 %v2585_v59, %v2846_v19 }
  0xbc   : > { %v2099_v29 = vpop.eup %2098  ;;  %v765_v27 = vadd.f32 %v2882_v3, %v653_v32  ;;  %v767_v53 = vadd.f32 %v2882_v3, %v655_v35  ;;  %v764_v21 = vadd.f32 %v2882_v3, %v652_v48  ;;  %v766_v36 = vadd.f32 %v2882_v3, %v654_v20  ;;  %v2898_v48 = vpop.permute.xlu0 %735 }
  0xbd   : > { %v2101_v11 = vpop.eup %2100  ;;  %v1910_v13 = vpack.c.bf16 %v2099_v29, %v2091_v2  ;;  %v409_v32 = vmul.f32 %v2607_v8, %v2687_v43  ;;  %v676_v20 = vadd.f32 %v612_v40, %v444_v39 }
  0xbe   : > { %v2103_v22 = vpop.eup %2102  ;;  %v1926_v57 = vpack.c.bf16 %v2101_v11, %v2093_v24  ;;  %2114 = vtanh.f32 %v765_v27  ;;  %v789_v11 = vadd.f32 %v2898_v48, %v677_v18  ;;  %v678_v24 = vadd.f32 %v614_v31, %v446_v16 }
  0xbf   : > { %v2105_v35 = vpop.eup %2104  ;;  %v2900_v17 = vpop.permute.xlu1 %322  ;;  %1911 = vmatprep.subr.bf16.mxu0 %v1910_v13  ;;  %v1912_v2 = vpack.c.bf16 %v2103_v22, %v2095_v51  ;;  %2116 = vtanh.f32 %v767_v53  ;;  %v411_v13 = vmul.f32 %v2611_v10, %v2687_v43  ;;  %v641_v31 = vadd.f32 %v2646_v26, %v409_v32 }
  0xc0   : > { %1927 = vmatprep.subr.bf16.mxu1 %v1926_v57  ;;  %v1928_v29 = vpack.c.bf16 %v2105_v35, %v2097_v12  ;;  %2118 = vtanh.f32 %v764_v21  ;;  %v791_v57 = vadd.f32 %v2898_v48, %v679_v50  ;;  %v2917_v21 = vadd.f32 %v2682_v41, %v436_v9  ;;  %v2107_v39 = vpop.eup %2106 }
  0xc1   : > { %1913 = vmatpush1.bf16.msra.mxu0 %v1912_v2  ;;  %2120 = vtanh.f32 %v766_v36  ;;  %v419_v51 = vmul.f32 %v2611_v10, %v2730_v49  ;;  %v788_v18 = vadd.f32 %v2898_v48, %v676_v20  ;;  %v453_v40 = vmul.f32 %v2599_v4, %v2900_v17  ;;  %v2109_v50 = vpop.eup %2108 }
  0xc2   : > { %1929 = vmatpush1.bf16.msra.mxu1 %v1928_v29  ;;  %v455_v43 = vmul.f32 %v2601_v5, %v2900_v17  ;;  %v452_v41 = vmul.f32 %v2603_v6, %v2900_v17  ;;  %2122 = vtanh.f32 %v789_v11  ;;  %v670_v26 = vadd.f32 %v2685_v42, %v438_v55  ;;  %v2111_v27 = vpop.eup %2110 }
  0xc3   : > { %v2922_v12 = vpop.permute.xlu1 %327  ;;  %v790_v49 = vadd.f32 %v2898_v48, %v678_v24  ;;  %v649_v9 = vadd.f32 %v2690_v44, %v417_v34  ;;  %v2936_v53 = vmul.f32 %v2587_v60, %v2900_v17  ;;  %v2940_v36 = vmul.f32 %v2589_v61, %v2900_v17  ;;  %v2113_v32 = vpop.eup %2112 }
  0xc4   : > { %v753_v16 = vadd.f32 %v2756_v14, %v641_v31  ;;  %v643_v22 = vadd.f32 %v2649_v28, %v411_v13  ;;  %2124 = vtanh.f32 %v791_v57  ;;  %v454_v42 = vmul.f32 %v2605_v7, %v2900_v17 }
  0xc5   : > { %v761_v55 = vadd.f32 %v2806_v47, %v649_v9  ;;  %v651_v44 = vadd.f32 %v2693_v45, %v419_v51  ;;  %2126 = vtanh.f32 %v788_v18  ;;  %v685_v35 = vadd.f32 %v2712_v52, %v453_v40  ;;  %v3454_v45 = vld [vmem:[#allocation7_spill] sm:$0xff] }
  0xc6   : > { %v687_v2 = vadd.f32 %v2722_v56, %v455_v43  ;;  %v684_v20 = vadd.f32 %v2738_v33, %v452_v41  ;;  %v2953_v28 = vmul.f32 %v2587_v60, %v2922_v12  ;;  %2128 = vtanh.f32 %v790_v49  ;;  %v3455_v56 = vld [vmem:[#allocation13_spill] sm:$0xff] }
  0xc7   : > { %v755_v11 = vadd.f32 %v2756_v14, %v643_v22  ;;  %v640_v24 = vadd.f32 %v3454_v45, %v2754_v30  ;;  %v461_v52 = vmul.f32 %v2599_v4, %v2922_v12  ;;  %v763_v33 = vadd.f32 %v2806_v47, %v651_v44 }
  0xc8   : > { %v2115_v34 = vpop.eup %2114  ;;  %v2955_v29 = vpop.permute.xlu1 %497  ;;  %v648_v31 = vadd.f32 %v3455_v56, %v2800_v15  ;;  %v463_v18 = vmul.f32 %v2601_v5, %v2922_v12  ;;  %2130 = vtanh.f32 %v753_v16  ;;  %v462_v15 = vmul.f32 %v2605_v7, %v2922_v12  ;;  %v3458_v16 = vld [vmem:[#allocation8_spill] sm:$0xff] }
  0xc9   : > { %v2117_v13 = vpop.eup %2116  ;;  %v1914_v57 = vpack.c.bf16 %v2107_v39, %v2115_v34  ;;  %v752_v40 = vadd.f32 %v2756_v14, %v640_v24  ;;  %v460_v39 = vmul.f32 %v2603_v6, %v2922_v12  ;;  %2132 = vtanh.f32 %v761_v55  ;;  %v3462_v24 = vld [vmem:[#allocation5_spill] sm:$0xff] }
  0xca   : > { %v2119_v60 = vpop.eup %2118  ;;  %v1930_v51 = vpack.c.bf16 %v2109_v50, %v2117_v13  ;;  %v760_v4 = vadd.f32 %v2806_v47, %v648_v31  ;;  %v3456_v50 = vld [vmem:[#allocation24_spill] sm:$0xff]  ;;  %2134 = vtanh.f32 %v755_v11  ;;  %v629_v9 = vmul.f32 %v2591_v62, %v2955_v29 }
  0xcb   : > { %v2121_v43 = vpop.eup %2120  ;;  %1915 = vmatprep.subr.bf16.mxu0 %v1914_v57  ;;  %v1916_v30 = vpack.c.bf16 %v2111_v27, %v2119_v60  ;;  %v686_v49 = vadd.f32 %v3456_v50, %v454_v42  ;;  %v631_v6 = vmul.f32 %v2593_v63, %v2955_v29  ;;  %2136 = vtanh.f32 %v763_v33  ;;  %v3457_v27 = vld [vmem:[#allocation29_spill] sm:$0xff] }
  0xcc   : > { %1931 = vmatprep.subr.bf16.mxu1 %v1930_v51  ;;  %v1932_v41 = vpack.c.bf16 %v2113_v32, %v2121_v43  ;;  %v642_v22 = vadd.f32 %v3458_v16, %v3457_v27  ;;  %v2982_v55 = vpop.eup %2122  ;;  %2138 = vtanh.f32 %v752_v40  ;;  %v628_v63 = vmul.f32 %v2595_v0, %v2955_v29 }
  0xcd   : > { %1917 = vmatpush1.bf16.msra.mxu0 %v1916_v30  ;;  %v2974_v5 = vpop.permute.xlu1 %730  ;;  %v630_v32 = vmul.f32 %v2597_v1, %v2955_v29  ;;  %2140 = vtanh.f32 %v760_v4  ;;  %v3007_v0 = vmul.f32 %v2583_v58, %v2955_v29  ;;  %v693_v57 = vadd.f32 %v629_v9, %v461_v52  ;;  %v3464_v4 = vld [vmem:[#allocation25_spill] sm:$0xff] }
  0xce   : > { %1933 = vmatpush1.bf16.msra.mxu1 %v1932_v41  ;;  %v781_v7 = vadd.f32 %v2974_v5, %v2868_v23  ;;  %v783_v42 = vadd.f32 %v2974_v5, %v2874_v25  ;;  %v780_v44 = vadd.f32 %v2974_v5, %v2917_v21  ;;  %v782_v62 = vadd.f32 %v2974_v5, %v670_v26  ;;  %v2995_v34 = vpop.eup %2124  ;;  %v3459_v23 = vld [vmem:[#allocation14_spill] sm:$0xff]  ;;  %v3461_v21 = vld [vmem:[#allocation21_spill] sm:$0xff] }
  0xcf   : > { %v650_v11 = vadd.f32 %v3459_v23, %v2804_v54  ;;  %v3460_v25 = vld [vmem:[#allocation30_spill] sm:$0xff]  ;;  %v601_v13 = vmul.f32 %v3462_v24, %v3461_v21  ;;  %v3003_v26 = vpop.eup %2126  ;;  %v695_v33 = vadd.f32 %v631_v6, %v463_v18  ;;  %v692_v51 = vadd.f32 %v628_v63, %v460_v39 }
  0xd0   : > { %2142 = vtanh.f32 %v781_v7  ;;  %v425_v45 = vmul.f32 %v2607_v8, %v3460_v25  ;;  %v3011_v56 = vpop.eup %2128  ;;  %v694_v40 = vadd.f32 %v630_v32, %v462_v15  ;;  %v754_v52 = vadd.f32 %v2756_v14, %v642_v22  ;;  %v3465_v15 = vld [vmem:[#allocation6_spill] sm:$0xff]  ;;  %v3467_v7 = vld [vmem:[#allocation9_spill] sm:$0xff]  ;;  %v3469_v32 = vld [vmem:[#allocation12_spill] sm:$0xff] }
  0xd1   : > { %v3009_v1 = vpop.permute.xlu1 %740  ;;  %2144 = vtanh.f32 %v783_v42  ;;  %v762_v18 = vadd.f32 %v2806_v47, %v650_v11  ;;  %v427_v30 = vmul.f32 %v2611_v10, %v3460_v25  ;;  %v665_v41 = vadd.f32 %v601_v13, %v3464_v4  ;;  %v3466_v22 = vld [vmem:[#allocation34_spill] sm:$0xff]  ;;  %v3471_v25 = vld [vmem:[#allocation31_spill] sm:$0xff]  ;;  %v3475_v4 = vld [vmem:[#allocation33_spill] sm:$0xff] }
  0xd2   : > { %2146 = vtanh.f32 %v780_v44  ;;  %v797_v54 = vadd.f32 %v3009_v1, %v685_v35  ;;  %v799_v31 = vadd.f32 %v3009_v1, %v687_v2  ;;  %v796_v60 = vadd.f32 %v3009_v1, %v684_v20  ;;  %v3017_v43 = vpop.eup %2130  ;;  %v3463_v20 = vld [vmem:[#allocation11_spill] sm:$0xff]  ;;  %v3470_v11 = vld [vmem:[#allocation22_spill] sm:$0xff] }
  0xd3   : > { %2148 = vtanh.f32 %v782_v62  ;;  %v798_v58 = vadd.f32 %v3009_v1, %v686_v49  ;;  %v3023_v35 = vpop.eup %2132  ;;  %v657_v39 = vadd.f32 %v3463_v20, %v425_v45  ;;  %v603_v50 = vmul.f32 %v3465_v15, %v3461_v21  ;;  %v3468_v62 = vld [vmem:[#allocation36_spill] sm:$0xff] }
  0xd4   : > { %2150 = vtanh.f32 %v797_v54  ;;  %v3031_v49 = vpop.eup %2134  ;;  %v656_v42 = vadd.f32 %v3467_v7, %v3466_v22  ;;  %v777_v63 = vadd.f32 %v3468_v62, %v665_v41  ;;  %v659_v23 = vadd.f32 %v3469_v32, %v427_v30 }
  0xd5   : > { %v3025_v2 = vpop.permute.xlu1 %745  ;;  %2152 = vtanh.f32 %v799_v31  ;;  %v3036_v6 = vpop.eup %2136  ;;  %v769_v16 = vadd.f32 %v2882_v3, %v657_v39  ;;  %v664_v45 = vadd.f32 %v3471_v25, %v3470_v11  ;;  %v1942_v13 = vpack.c.bf16 %v3023_v35, %v3017_v43  ;;  %v3476_v25 = vld [vmem:[#allocation23_spill] sm:$0xff] }
  0xd6   : > { %v805_v14 = vadd.f32 %v3025_v2, %v693_v57  ;;  %v807_v47 = vadd.f32 %v3025_v2, %v695_v33  ;;  %v804_v9 = vadd.f32 %v3025_v2, %v692_v51  ;;  %2154 = vtanh.f32 %v796_v60  ;;  %v3042_v44 = vpop.eup %2138  ;;  %v3472_v57 = vld [vmem:[#allocation35_spill] sm:$0xff]  ;;  %v3473_v33 = vld [vmem:[#allocation10_spill] sm:$0xff] }
  0xd7   : > { %v806_v27 = vadd.f32 %v3025_v2, %v694_v40  ;;  %2156 = vtanh.f32 %v798_v58  ;;  %v3048_v21 = vpop.eup %2140  ;;  %v658_v54 = vadd.f32 %v3473_v33, %v3472_v57  ;;  %v617_v31 = vmul.f32 %v3462_v24, %v2846_v19  ;;  %v3474_v51 = vld [vmem:[#allocation26_spill] sm:$0xff]  ;;  %v3478_v57 = vld [vmem:[#allocation17_spill] sm:$0xff] }
  0xd8   : > { %2158 = vtanh.f32 %v805_v14  ;;  %v667_v40 = vadd.f32 %v603_v50, %v3474_v51  ;;  %v771_v58 = vadd.f32 %v2882_v3, %v659_v23  ;;  %v619_v30 = vmul.f32 %v3465_v15, %v2846_v19 }
  0xd9   : > { %2160 = vtanh.f32 %v807_v47  ;;  %v441_v41 = vmul.f32 %v2607_v8, %v3475_v4  ;;  %v449_v14 = vmul.f32 %v2607_v8, %v2812_v37  ;;  %v443_v50 = vmul.f32 %v2611_v10, %v3475_v4  ;;  %v3482_v4 = vld [vmem:[#allocation15_spill] sm:$0xff] }
  0xda   : > { %v2143_v60 = vpop.eup %2142  ;;  %2162 = vtanh.f32 %v804_v9  ;;  %v451_v19 = vmul.f32 %v2611_v10, %v2812_v37  ;;  %v776_v37 = vadd.f32 %v3468_v62, %v664_v45 }
  0xdb   : > { %v2145_v20 = vpop.eup %2144  ;;  %v1918_v39 = vpack.c.bf16 %v2982_v55, %v2143_v60  ;;  %2164 = vtanh.f32 %v806_v27  ;;  %v779_v27 = vadd.f32 %v3468_v62, %v667_v40  ;;  %v681_v7 = vadd.f32 %v617_v31, %v449_v14 }
  0xdc   : > { %v2147_v47 = vpop.eup %2146  ;;  %v1934_v9 = vpack.c.bf16 %v2995_v34, %v2145_v20  ;;  %2166 = vtanh.f32 %v754_v52  ;;  %v768_v34 = vadd.f32 %v2882_v3, %v656_v42  ;;  %v683_v52 = vadd.f32 %v619_v30, %v451_v19  ;;  %v3479_v42 = vld [vmem:[#allocation18_spill] sm:$0xff] }
  0xdd   : > { %v2149_v22 = vpop.eup %2148  ;;  %1919 = vmatprep.subr.bf16.mxu0 %v1918_v39  ;;  %v1920_v55 = vpack.c.bf16 %v3003_v26, %v2147_v47  ;;  %2168 = vtanh.f32 %v762_v18  ;;  %v3477_v26 = vld [vmem:[#allocation32_spill] sm:$0xff]  ;;  %v673_v33 = vadd.f32 %v3478_v57, %v441_v41  ;;  %v675_v60 = vadd.f32 %v3479_v42, %v443_v50 }
  0xde   : > { %v2151_v32 = vpop.eup %2150  ;;  %1935 = vmatprep.subr.bf16.mxu1 %v1934_v9  ;;  %v1936_v23 = vpack.c.bf16 %v3011_v56, %v2149_v22  ;;  %2170 = vtanh.f32 %v769_v16  ;;  %v666_v18 = vadd.f32 %v3477_v26, %v3476_v25  ;;  %v1958_v56 = vpack.c.bf16 %v3036_v6, %v3031_v49  ;;  %v3480_v49 = vld [vmem:[#allocation39_spill] sm:$0xff]  ;;  %v3483_v9 = vld [vmem:[#allocation38_spill] sm:$0xff]  ;;  %v3484_v50 = vld [vmem:[#allocation16_spill] sm:$0xff] }
  0xdf   : > { %v2153_v11 = vpop.eup %2152  ;;  %1921 = vmatpush1.bf16.msra.mxu0 %v1920_v55  ;;  %2172 = vtanh.f32 %v777_v63  ;;  %v770_v16 = vadd.f32 %v2882_v3, %v658_v54  ;;  %v785_v45 = vadd.f32 %v2974_v5, %v673_v33  ;;  %v793_v40 = vadd.f32 %v2898_v48, %v681_v7  ;;  %v3485_v22 = vld [vmem:[#allocation40_spill] sm:$0xff]  ;;  %v3486_v25 = vld [vmem:[#allocation27_spill] sm:$0xff] }
  0xe0   : > { %v2155_v31 = vpop.eup %2154  ;;  %1937 = vmatpush1.bf16.msra.mxu1 %v1936_v23  ;;  %2174 = vtanh.f32 %v771_v58  ;;  %v778_v63 = vadd.f32 %v3468_v62, %v666_v18  ;;  %v787_v20 = vadd.f32 %v2974_v5, %v675_v60  ;;  %v795_v39 = vadd.f32 %v2898_v48, %v683_v52  ;;  %v3481_v58 = vld [vmem:[#allocation37_spill] sm:$0xff] }
  0xe1   : > { %v2157_v51 = vpop.eup %2156  ;;  %2176 = vtanh.f32 %v779_v27  ;;  %v680_v6 = vadd.f32 %v2907_v46, %v3480_v49  ;;  %v672_v41 = vadd.f32 %v3482_v4, %v3481_v58  ;;  %v457_v62 = vmul.f32 %v2607_v8, %v2900_v17 }
  0xe2   : > { %v2159_v30 = vpop.eup %2158  ;;  %2178 = vtanh.f32 %v768_v34  ;;  %v674_v19 = vadd.f32 %v3484_v50, %v3483_v9  ;;  %v682_v55 = vadd.f32 %v2911_v38, %v3485_v22  ;;  %v3106_v38 = vld [vmem:[%s3397_s3] sm:$0xff]  ;;  %v635_v18 = vmul.f32 %v3465_v15, %v2955_v29 }
  0xe3   : > { %v2161_v3 = vpop.eup %2160  ;;  %v1922_v54 = vpack.c.bf16 %v2159_v30, %v2151_v32  ;;  %2180 = vtanh.f32 %v776_v37  ;;  %v784_v7 = vadd.f32 %v2974_v5, %v672_v41  ;;  %v633_v32 = vmul.f32 %v3462_v24, %v2955_v29 }
  0xe4   : > { %v2163_v14 = vpop.eup %2162  ;;  %v1938_v47 = vpack.c.bf16 %v2161_v3, %v2153_v11  ;;  %2182 = vtanh.f32 %v770_v16  ;;  %v792_v52 = vadd.f32 %v2898_v48, %v680_v6  ;;  %v459_v11 = vmul.f32 %v2611_v10, %v2900_v17 }
  0xe5   : > { %v2165_v27 = vpop.eup %2164  ;;  %1923 = vmatprep.subr.bf16.mxu0 %v1922_v54  ;;  %v1924_v46 = vpack.c.bf16 %v2163_v14, %v2155_v31  ;;  %2184 = vtanh.f32 %v778_v63  ;;  %v465_v24 = vmul.f32 %v2607_v8, %v2922_v12  ;;  %v689_v26 = vadd.f32 %v3486_v25, %v457_v62 }
  0xe6   : > { %v2167_v23 = vpop.eup %2166  ;;  %1939 = vmatprep.subr.bf16.mxu1 %v1938_v47  ;;  %v1940_v34 = vpack.c.bf16 %v2165_v27, %v2157_v51  ;;  %2186 = vtanh.f32 %v785_v45  ;;  %v1944_v17 = vpack.c.bf16 %v3048_v21, %v3042_v44  ;;  %v786_v33 = vadd.f32 %v2974_v5, %v674_v19  ;;  %v3487_v44 = vld [vmem:[#allocation28_spill] sm:$0xff] }
  0xe7   : > { %v2169_v37 = vpop.eup %2168  ;;  %1925 = vmatpush1.bf16.msra.mxu0 %v1924_v46  ;;  %2188 = vtanh.f32 %v793_v40  ;;  %v794_v31 = vadd.f32 %v2898_v48, %v682_v55  ;;  %v697_v16 = vadd.f32 %v633_v32, %v465_v24  ;;  %v801_v15 = vadd.f32 %v3009_v1, %v689_v26  ;;  %v881_v24 = vld [vmem:[%s3397_s3 + $0x28] sm:$0xff] }
  0xe8   : > { %v2171_v57 = vpop.eup %2170  ;;  %1941 = vmatpush1.bf16.msra.mxu1 %v1940_v34  ;;  %1943 = vmatprep.subr.bf16.mxu0 %v1942_v13  ;;  %2190 = vtanh.f32 %v787_v20  ;;  %v467_v42 = vmul.f32 %v2611_v10, %v2922_v12  ;;  %v1960_v43 = vpack.c.bf16 %v2169_v37, %v2167_v23  ;;  %v691_v5 = vadd.f32 %v3487_v44, %v459_v11  ;;  %v3133_v10 = vld [vmem:[%s3397_s3 + $0x8] sm:$0xff] }
  0xe9   : > { %v2173_v8 = vpop.eup %2172  ;;  %1959 = vmatprep.subr.bf16.mxu1 %v1958_v56  ;;  %2192 = vtanh.f32 %v795_v39  ;;  %v634_v48 = vmul.f32 %v2585_v59, %v2955_v29  ;;  %v809_v13 = vadd.f32 %v3025_v2, %v697_v16  ;;  %v3488_v29 = vld [vmem:[#allocation19_spill] sm:$0xff]  ;;  %v466_v30 = vmul.f32 %v2589_v61, %v2922_v12  ;;  %v3490_v61 = vld [vmem:[#allocation20_spill] sm:$0xff] }
  0xea   : > { %v2175_v60 = vpop.eup %2174  ;;  %1868 = vmatmul.mubr.msk.f32.vlgmr.msra.gmra.mrb[0].mxu0 %vm932_vm0, %v3106_v38  ;;  %v1946_v35 = vpack.c.bf16 %v2173_v8, %v2171_v57  ;;  %2194 = vtanh.f32 %v784_v7  ;;  %v699_v56 = vadd.f32 %v635_v18, %v467_v42  ;;  %v803_v59 = vadd.f32 %v3009_v1, %v691_v5  ;;  %v880_v7 = vld [vmem:[%s3397_s3 + $0x20] sm:$0xff]  ;;  %v883_v16 = vld [vmem:[%s3397_s3 + $0x38] sm:$0xff] }
  0xeb   : > { %v2177_v21 = vpop.eup %2176  ;;  %1876 = vmatmul.mubr.msk.f32.vlgmr.msra.gmra.mrb[0].mxu1 %vm932_vm0, %v3106_v38  ;;  %1945 = vmatpush1.bf16.msra.mxu0 %v1944_v17  ;;  %2196 = vtanh.f32 %v792_v52  ;;  %v688_v45 = vadd.f32 %v3488_v29, %v2936_v53  ;;  %v3489_v20 = vmov 0.0   ;;  %v696_v49 = vadd.f32 %v3007_v0, %v2953_v28  ;;  %v3157_v28 = vld [vmem:[%s3397_s3 + $0x10] sm:$0xff] }
  0xec   : > { %v2179_v51 = vpop.eup %2178  ;;  %1961 = vmatpush1.bf16.msra.mxu1 %v1960_v43  ;;  %1947 = vmatprep.subr.bf16.mxu0 %v1946_v35  ;;  %v1962_v63 = vpack.c.bf16 %v2177_v21, %v2175_v60  ;;  %2198 = vtanh.f32 %v786_v33  ;;  %v811_v39 = vadd.f32 %v3025_v2, %v699_v56  ;;  %v690_v12 = vadd.f32 %v3490_v61, %v2940_v36 }
  0xed   : > { %v2181_v40 = vpop.eup %2180  ;;  %1027 = vmatprep.mubr.f32.mxu0 %v3489_v20  ;;  %1140 = vmatprep.mubr.f32.mxu1 %v3489_v20  ;;  %2200 = vtanh.f32 %v794_v31  ;;  %v800_v3 = vadd.f32 %v3009_v1, %v688_v45  ;;  %v808_v0 = vadd.f32 %v3025_v2, %v696_v49  ;;  %v698_v58 = vadd.f32 %v634_v48, %v466_v30  ;;  %v882_v31 = vld [vmem:[%s3397_s3 + $0x30] sm:$0xff]  ;;  %v3254_v48 = vpop.permute.xlu1 %899 }
  0xee   : > { %v2183_v6 = vpop.eup %2182  ;;  %1963 = vmatprep.subr.bf16.mxu1 %v1962_v63  ;;  %1869 = vmatmul.mubr.msk.f32.gmra.mrb[2].mxu0 %vm932_vm0, %v3133_v10  ;;  %v1948_v53 = vpack.c.bf16 %v2181_v40, %v2179_v51  ;;  %2202 = vtanh.f32 %v801_v15  ;;  %v802_v36 = vadd.f32 %v3009_v1, %v690_v12  ;;  %v3171_v1 = vld [vmem:[%s3397_s3 + $0x18] sm:$0xff] }
  0xef   : > { %v2185_v54 = vpop.eup %2184  ;;  %1877 = vmatmul.mubr.msk.f32.gmra.mrb[2].mxu1 %vm932_vm0, %v3133_v10  ;;  %1033 = vmatprep.mubr.f32.mxu0 %v3489_v20  ;;  %2204 = vtanh.f32 %v809_v13  ;;  %v810_v14 = vadd.f32 %v3025_v2, %v698_v58 }
  0xf0   : > { %v2187_v4 = vpop.eup %2186  ;;  %1949 = vmatpush1.bf16.msra.mxu0 %v1948_v53  ;;  %v1964_v41 = vpack.c.bf16 %v2185_v54, %v2183_v6  ;;  %1146 = vmatprep.mubr.f32.mxu1 %v3489_v20  ;;  %2206 = vtanh.f32 %v803_v59 }
  0xf1   : > { %v2189_v62 = vpop.eup %2188  ;;  %2208 = vtanh.f32 %v811_v39  ;;  %v3266_v54 = vpop.permute.xlu1 %909 }
  0xf2   : > { %v2191_v47 = vpop.eup %2190  ;;  %1965 = vmatpush1.bf16.msra.mxu1 %v1964_v41  ;;  %v1950_v9 = vpack.c.bf16 %v2189_v62, %v2187_v4  ;;  %1870 = vmatmul.mubr.msk.f32.gmra.mrb[4].mxu0 %vm932_vm0, %v3157_v28  ;;  %2210 = vtanh.f32 %v800_v3 }
  0xf3   : > { %v2193_v50 = vpop.eup %2192  ;;  %1878 = vmatmul.mubr.msk.f32.gmra.mrb[4].mxu1 %vm932_vm0, %v3157_v28  ;;  %1039 = vmatprep.mubr.f32.mxu0 %v3489_v20  ;;  %2212 = vtanh.f32 %v808_v0 }
  0xf4   : > { %v2195_v2 = vpop.eup %2194  ;;  %1951 = vmatprep.subr.bf16.mxu0 %v1950_v9  ;;  %v1966_v19 = vpack.c.bf16 %v2193_v50, %v2191_v47  ;;  %1152 = vmatprep.mubr.f32.mxu1 %v3489_v20  ;;  %2214 = vtanh.f32 %v802_v36 }
  0xf5   : > { %v2197_v22 = vpop.eup %2196  ;;  %2216 = vtanh.f32 %v810_v14 }
  0xf6   : > { %v2199_v55 = vpop.eup %2198  ;;  %1967 = vmatprep.subr.bf16.mxu1 %v1966_v19  ;;  %v1952_v27 = vpack.c.bf16 %v2197_v22, %v2195_v2  ;;  %1871 = vmatmul.mubr.msk.f32.gmra.mrb[6].mxu0 %vm932_vm0, %v3171_v1 }
  0xf7   : > { %v2201_v46 = vpop.eup %2200  ;;  %1879 = vmatmul.mubr.msk.f32.gmra.mrb[6].mxu1 %vm932_vm0, %v3171_v1  ;;  %1045 = vmatprep.mubr.f32.mxu0 %v3489_v20 }
  0xf8   : > { %v2203_v32 = vpop.eup %2202  ;;  %1953 = vmatpush1.bf16.msra.mxu0 %v1952_v27  ;;  %v1968_v23 = vpack.c.bf16 %v2201_v46, %v2199_v55  ;;  %1158 = vmatprep.mubr.f32.mxu1 %v3489_v20 }
  0xf9   : > { %v2205_v34 = vpop.eup %2204 }
  0xfa   : > { %v2207_v52 = vpop.eup %2206  ;;  %1969 = vmatpush1.bf16.msra.mxu1 %v1968_v23  ;;  %v1954_v11 = vpack.c.bf16 %v2205_v34, %v2203_v32  ;;  %1872 = vmatmul.mubr.msk.f32.gmra.mrb[8].mxu0 %vm932_vm0, %v880_v7 }
  0xfb   : > { %v2209_v37 = vpop.eup %2208  ;;  %1880 = vmatmul.mubr.msk.f32.gmra.mrb[8].mxu1 %vm932_vm0, %v880_v7  ;;  %1051 = vmatprep.mubr.f32.mxu0 %v3489_v20 }
  0xfc   : > { %v2211_v25 = vpop.eup %2210  ;;  %1955 = vmatprep.subr.bf16.mxu0 %v1954_v11  ;;  %v1970_v26 = vpack.c.bf16 %v2209_v37, %v2207_v52  ;;  %1164 = vmatprep.mubr.f32.mxu1 %v3489_v20 }
  0xfd   : > { %v2213_v18 = vpop.eup %2212 }
  0xfe   : > { %v2215_v57 = vpop.eup %2214  ;;  %1971 = vmatprep.subr.bf16.mxu1 %v1970_v26  ;;  %v1956_v17 = vpack.c.bf16 %v2213_v18, %v2211_v25  ;;  %1873 = vmatmul.mubr.msk.f32.gmra.mrb[10].mxu0 %vm932_vm0, %v881_v24  ;;  %v3278_v26 = vpop.permute.xlu1 %919 }
  0xff   : > { %v2217_v33 = vpop.eup %2216  ;;  %1881 = vmatmul.mubr.msk.f32.gmra.mrb[10].mxu1 %vm932_vm0, %v881_v24  ;;  %1057 = vmatprep.mubr.f32.mxu0 %v3489_v20 }
 0x100   : > { %1957 = vmatpush1.bf16.msra.mxu0 %v1956_v17  ;;  %v1972_v8 = vpack.c.bf16 %v2217_v33, %v2215_v57  ;;  %1170 = vmatprep.mubr.f32.mxu1 %v3489_v20 }
 0x102   : > { %1973 = vmatpush1.bf16.msra.mxu1 %v1972_v8  ;;  %1874 = vmatmul.mubr.msk.f32.gmra.mrb[12].mxu0 %vm932_vm0, %v882_v31 }
 0x103   : > { %1882 = vmatmul.mubr.msk.f32.gmra.mrb[12].mxu1 %vm932_vm0, %v882_v31  ;;  %1063 = vmatprep.mubr.f32.mxu0 %v3489_v20 }
 0x104   : > { %1176 = vmatprep.mubr.f32.mxu1 %v3489_v20 }
 0x106   : > { %1875 = vmatmul.mubr.msk.f32.gmra.mrb[14].mxu0 %vm932_vm0, %v883_v16 }
 0x107   : > { %1883 = vmatmul.mubr.msk.f32.gmra.mrb[14].mxu1 %vm932_vm0, %v883_v16  ;;  %1247 = vmatprep.mubr.f32.mxu0 %v3489_v20 }
 0x108   : > { %1360 = vmatprep.mubr.f32.mxu1 %v3489_v20 }
 0x10a   : > { %1884 = vmatmul.mubr.msk.f32.vlgmr.msra.gmra.mrb[16].mxu0 %vm932_vm0, %v3106_v38 }
 0x10b   : > { %1892 = vmatmul.mubr.msk.f32.vlgmr.msra.gmra.mrb[16].mxu1 %vm932_vm0, %v3106_v38  ;;  %1253 = vmatprep.mubr.f32.mxu0 %v3489_v20  ;;  %v3248_v38 = vpop.permute.xlu0 %894 }
 0x10c   : > { %1366 = vmatprep.mubr.f32.mxu1 %v3489_v20 }
 0x10e   : > { %1885 = vmatmul.mubr.msk.f32.gmra.mrb[18].mxu0 %vm932_vm0, %v3133_v10 }
 0x10f   : > { %1893 = vmatmul.mubr.msk.f32.gmra.mrb[18].mxu1 %vm932_vm0, %v3133_v10  ;;  %1259 = vmatprep.mubr.f32.mxu0 %v3489_v20  ;;  %v3260_v40 = vpop.permute.xlu0 %904 }
 0x110   : > { %1372 = vmatprep.mubr.f32.mxu1 %v3489_v20 }
 0x112   : > { %1886 = vmatmul.mubr.msk.f32.gmra.mrb[20].mxu0 %vm932_vm0, %v3157_v28 }
 0x113   : > { %1894 = vmatmul.mubr.msk.f32.gmra.mrb[20].mxu1 %vm932_vm0, %v3157_v28  ;;  %1265 = vmatprep.mubr.f32.mxu0 %v3489_v20  ;;  %v3272_v2 = vpop.permute.xlu0 %914 }
 0x114   : > { %1378 = vmatprep.mubr.f32.mxu1 %v3489_v20 }
 0x116   : > { %1887 = vmatmul.mubr.msk.f32.gmra.mrb[22].mxu0 %vm932_vm0, %v3171_v1 }
 0x117   : > { %1895 = vmatmul.mubr.msk.f32.gmra.mrb[22].mxu1 %vm932_vm0, %v3171_v1  ;;  %1271 = vmatprep.mubr.f32.mxu0 %v3489_v20 }
 0x118   : > { %1384 = vmatprep.mubr.f32.mxu1 %v3489_v20 }
 0x11a   : > { %1888 = vmatmul.mubr.msk.f32.gmra.mrb[24].mxu0 %vm932_vm0, %v880_v7 }
 0x11b   : > { %1896 = vmatmul.mubr.msk.f32.gmra.mrb[24].mxu1 %vm932_vm0, %v880_v7  ;;  %1277 = vmatprep.mubr.f32.mxu0 %v3489_v20 }
 0x11c   : > { %1390 = vmatprep.mubr.f32.mxu1 %v3489_v20 }
 0x11e   : > { %1889 = vmatmul.mubr.msk.f32.gmra.mrb[26].mxu0 %vm932_vm0, %v881_v24 }
 0x11f   : > { %1897 = vmatmul.mubr.msk.f32.gmra.mrb[26].mxu1 %vm932_vm0, %v881_v24  ;;  %1283 = vmatprep.mubr.f32.mxu0 %v3489_v20 }
 0x120   : > { %1396 = vmatprep.mubr.f32.mxu1 %v3489_v20 }
 0x122   : > { %1890 = vmatmul.mubr.msk.f32.gmra.mrb[28].mxu0 %vm932_vm0, %v882_v31 }
 0x123   : > { %1898 = vmatmul.mubr.msk.f32.gmra.mrb[28].mxu1 %vm932_vm0, %v882_v31  ;;  %1289 = vmatprep.mubr.f32.mxu0 %v3489_v20 }
 0x124   : > { %1402 = vmatprep.mubr.f32.mxu1 %v3489_v20 }
 0x126   : > { %1891 = vmatmul.mubr.msk.f32.gmra.mrb[30].mxu0 %vm932_vm0, %v883_v16 }
 0x127   : > { %1899 = vmatmul.mubr.msk.f32.gmra.mrb[30].mxu1 %vm932_vm0, %v883_v16  ;;  %1547 = vmatprep.mubr.f32.mxu0 %v3489_v20 }
 0x128   : > { %1618 = vmatprep.mubr.f32.mxu1 %v3489_v20 }
 0x1bd   : > { %v1023_v15 = vpop.f32.mrb[0].mxu0 }
 0x1be   : > { %v1024_v42 = vadd.f32 %v1023_v15, %v3248_v38  ;;  %v1136_v60 = vpop.f32.mrb[0].mxu1  ;;  %v1025_v43 = vpop.f32.mrb[1].mxu0 }
 0x1bf   : > { %v1137_v35 = vadd.f32 %v1136_v60, %v3248_v38  ;;  %v1026_v44 = vadd.f32 %v1025_v43, %v3248_v38  ;;  %v1138_v5 = vpop.f32.mrb[1].mxu1 }
 0x1c0   : > { %2218 = vtanh.f32 %v1024_v42  ;;  %v1139_v21 = vadd.f32 %v1138_v5, %v3248_v38 }
 0x1c1   : > { %2220 = vtanh.f32 %v1137_v35  ;;  %v1029_v10 = vpop.f32.mrb[2].mxu0 }
 0x1c2   : > { %2222 = vtanh.f32 %v1026_v44  ;;  %v1030_v13 = vadd.f32 %v1029_v10, %v3254_v48  ;;  %v1142_v56 = vpop.f32.mrb[2].mxu1  ;;  %v1031_v51 = vpop.f32.mrb[3].mxu0 }
 0x1c3   : > { %2224 = vtanh.f32 %v1139_v21  ;;  %v1143_v63 = vadd.f32 %v1142_v56, %v3254_v48  ;;  %v1032_v59 = vadd.f32 %v1031_v51, %v3254_v48  ;;  %v1144_v29 = vpop.f32.mrb[3].mxu1  ;;  %v3284_v21 = vpop.permute.xlu0 %924 }
 0x1c4   : > { %2226 = vtanh.f32 %v1030_v13  ;;  %v1145_v45 = vadd.f32 %v1144_v29, %v3254_v48 }
 0x1c5   : > { %2228 = vtanh.f32 %v1143_v63  ;;  %v1035_v30 = vpop.f32.mrb[4].mxu0 }
 0x1c6   : > { %2230 = vtanh.f32 %v1032_v59  ;;  %v1036_v39 = vadd.f32 %v1035_v30, %v3260_v40  ;;  %v1148_v49 = vpop.f32.mrb[4].mxu1  ;;  %v1037_v6 = vpop.f32.mrb[5].mxu0 }
 0x1c7   : > { %2232 = vtanh.f32 %v1145_v45  ;;  %v1149_v53 = vadd.f32 %v1148_v49, %v3260_v40  ;;  %v1038_v3 = vadd.f32 %v1037_v6, %v3260_v40  ;;  %v1150_v61 = vpop.f32.mrb[5].mxu1 }
 0x1c8   : > { %2234 = vtanh.f32 %v1036_v39  ;;  %v1151_v12 = vadd.f32 %v1150_v61, %v3260_v40  ;;  %v3290_v61 = vpop.permute.xlu1 %929 }
 0x1c9   : > { %2236 = vtanh.f32 %v1149_v53  ;;  %v1041_v28 = vpop.f32.mrb[6].mxu0 }
 0x1ca   : > { %v2219_v0 = vpop.eup %2218  ;;  %2238 = vtanh.f32 %v1038_v3  ;;  %v1042_v58 = vadd.f32 %v1041_v28, %v3266_v54  ;;  %v1154_v4 = vpop.f32.mrb[6].mxu1 }
 0x1cb   : > { %v1043_v41 = vpop.f32.mrb[7].mxu0  ;;  %v2221_v36 = vpop.eup %2220  ;;  %2240 = vtanh.f32 %v1151_v12  ;;  %v1155_v62 = vadd.f32 %v1154_v4, %v3266_v54 }
 0x1cc   : > { %v1044_v14 = vadd.f32 %v1043_v41, %v3266_v54  ;;  %v1156_v47 = vpop.f32.mrb[7].mxu1  ;;  %v2223_v9 = vpop.eup %2222  ;;  %2242 = vtanh.f32 %v1042_v58 }
 0x1cd   : > { %v1157_v50 = vadd.f32 %v1156_v47, %v3266_v54  ;;  %v2225_v1 = vpop.eup %2224  ;;  %2244 = vtanh.f32 %v1155_v62  ;;  %v1047_v19 = vpop.f32.mrb[8].mxu0 }
 0x1ce   : > { %v2227_v22 = vpop.eup %2226  ;;  %2246 = vtanh.f32 %v1044_v14  ;;  %v1048_v55 = vadd.f32 %v1047_v19, %v3272_v2  ;;  %v1160_v27 = vpop.f32.mrb[8].mxu1 }
 0x1cf   : > { %v1049_v46 = vpop.f32.mrb[9].mxu0  ;;  %v2229_v7 = vpop.eup %2228  ;;  %2248 = vtanh.f32 %v1157_v50  ;;  %v1161_v32 = vadd.f32 %v1160_v27, %v3272_v2  ;;  %v1976_v52 = vpack.c.bf16 %v2227_v22, %v2219_v0 }
 0x1d0   : > { %v1050_v23 = vadd.f32 %v1049_v46, %v3272_v2  ;;  %v1162_v34 = vpop.f32.mrb[9].mxu1  ;;  %v2231_v11 = vpop.eup %2230  ;;  %2250 = vtanh.f32 %v1048_v55  ;;  %v1992_v24 = vpack.c.bf16 %v2229_v7, %v2221_v36 }
 0x1d1   : > { %v1163_v37 = vadd.f32 %v1162_v34, %v3272_v2  ;;  %v2233_v25 = vpop.eup %2232  ;;  %2252 = vtanh.f32 %v1161_v32  ;;  %v1053_v18 = vpop.f32.mrb[10].mxu0  ;;  %v1974_v57 = vpack.c.bf16 %v2231_v11, %v2223_v9 }
 0x1d2   : > { %v2235_v17 = vpop.eup %2234  ;;  %2254 = vtanh.f32 %v1050_v23  ;;  %v1054_v33 = vadd.f32 %v1053_v18, %v3278_v26  ;;  %v1166_v31 = vpop.f32.mrb[10].mxu1  ;;  %v1990_v16 = vpack.c.bf16 %v2233_v25, %v2225_v1 }
 0x1d3   : > { %v1055_v8 = vpop.f32.mrb[11].mxu0  ;;  %v2237_v15 = vpop.eup %2236  ;;  %2256 = vtanh.f32 %v1163_v37  ;;  %v1167_v42 = vadd.f32 %v1166_v31, %v3278_v26  ;;  %1975 = vmatprep.subr.bf16.mxu0 %v1974_v57 }
 0x1d4   : > { %v1056_v60 = vadd.f32 %v1055_v8, %v3278_v26  ;;  %v1168_v43 = vpop.f32.mrb[11].mxu1  ;;  %v2239_v35 = vpop.eup %2238  ;;  %2258 = vtanh.f32 %v1054_v33  ;;  %1991 = vmatprep.subr.bf16.mxu1 %v1990_v16  ;;  %1977 = vmatpush1.bf16.msra.mxu0 %v1976_v52 }
 0x1d5   : > { %v1169_v44 = vadd.f32 %v1168_v43, %v3278_v26  ;;  %v2241_v5 = vpop.eup %2240  ;;  %2260 = vtanh.f32 %v1167_v42  ;;  %1993 = vmatpush1.bf16.msra.mxu1 %v1992_v24  ;;  %v1059_v10 = vpop.f32.mrb[12].mxu0 }
 0x1d6   : > { %v2243_v13 = vpop.eup %2242  ;;  %2262 = vtanh.f32 %v1056_v60  ;;  %v1060_v56 = vadd.f32 %v1059_v10, %v3284_v21  ;;  %v1172_v51 = vpop.f32.mrb[12].mxu1 }
 0x1d7   : > { %v1061_v63 = vpop.f32.mrb[13].mxu0  ;;  %v2245_v59 = vpop.eup %2244  ;;  %2264 = vtanh.f32 %v1169_v44  ;;  %v1173_v29 = vadd.f32 %v1172_v51, %v3284_v21  ;;  %v1980_v39 = vpack.c.bf16 %v2243_v13, %v2235_v17 }
 0x1d8   : > { %v1062_v45 = vadd.f32 %v1061_v63, %v3284_v21  ;;  %v1174_v30 = vpop.f32.mrb[13].mxu1  ;;  %v2247_v49 = vpop.eup %2246  ;;  %2266 = vtanh.f32 %v1060_v56  ;;  %v1996_v53 = vpack.c.bf16 %v2245_v59, %v2237_v15 }
 0x1d9   : > { %v1175_v6 = vadd.f32 %v1174_v30, %v3284_v21  ;;  %v2249_v3 = vpop.eup %2248  ;;  %2268 = vtanh.f32 %v1173_v29  ;;  %v1065_v12 = vpop.f32.mrb[14].mxu0  ;;  %v1978_v28 = vpack.c.bf16 %v2247_v49, %v2239_v35 }
 0x1da   : > { %v2251_v0 = vpop.eup %2250  ;;  %2270 = vtanh.f32 %v1062_v45  ;;  %v1066_v58 = vadd.f32 %v1065_v12, %v3290_v61  ;;  %v1178_v4 = vpop.f32.mrb[14].mxu1  ;;  %v1994_v36 = vpack.c.bf16 %v2249_v3, %v2241_v5 }
 0x1db   : > { %v1067_v41 = vpop.f32.mrb[15].mxu0  ;;  %v2253_v62 = vpop.eup %2252  ;;  %2272 = vtanh.f32 %v1175_v6  ;;  %v1179_v14 = vadd.f32 %v1178_v4, %v3290_v61  ;;  %1979 = vmatprep.subr.bf16.mxu0 %v1978_v28 }
 0x1dc   : > { %v1068_v47 = vadd.f32 %v1067_v41, %v3290_v61  ;;  %v1180_v9 = vpop.f32.mrb[15].mxu1  ;;  %v2255_v50 = vpop.eup %2254  ;;  %2274 = vtanh.f32 %v1066_v58  ;;  %1995 = vmatprep.subr.bf16.mxu1 %v1994_v36  ;;  %1981 = vmatpush1.bf16.msra.mxu0 %v1980_v39 }
 0x1dd   : > { %v1181_v1 = vadd.f32 %v1180_v9, %v3290_v61  ;;  %v2257_v19 = vpop.eup %2256  ;;  %2276 = vtanh.f32 %v1179_v14  ;;  %1997 = vmatpush1.bf16.msra.mxu1 %v1996_v53  ;;  %v1249_v22 = vpop.f32.mrb[16].mxu0 }
 0x1de   : > { %v2259_v55 = vpop.eup %2258  ;;  %2278 = vtanh.f32 %v1068_v47  ;;  %v1250_v27 = vadd.f32 %v1249_v22, %v3248_v38  ;;  %v1362_v46 = vpop.f32.mrb[16].mxu1 }
 0x1df   : > { %v1251_v7 = vpop.f32.mrb[17].mxu0  ;;  %v2261_v32 = vpop.eup %2260  ;;  %2280 = vtanh.f32 %v1181_v1  ;;  %v1363_v23 = vadd.f32 %v1362_v46, %v3248_v38  ;;  %v1984_v11 = vpack.c.bf16 %v2259_v55, %v2251_v0 }
 0x1e0   : > { %v1252_v34 = vadd.f32 %v1251_v7, %v3248_v38  ;;  %v1364_v52 = vpop.f32.mrb[17].mxu1  ;;  %v2263_v37 = vpop.eup %2262  ;;  %2282 = vtanh.f32 %v1250_v27  ;;  %v2000_v25 = vpack.c.bf16 %v2261_v32, %v2253_v62 }
 0x1e1   : > { %v1365_v24 = vadd.f32 %v1364_v52, %v3248_v38  ;;  %v2265_v18 = vpop.eup %2264  ;;  %2284 = vtanh.f32 %v1363_v23  ;;  %v1255_v57 = vpop.f32.mrb[18].mxu0  ;;  %v1982_v17 = vpack.c.bf16 %v2263_v37, %v2255_v50  ;;  %v3315_v50 = vld [vmem:[%s3399_s5] sm:$0xf] }
 0x1e2   : > { %v2267_v33 = vpop.eup %2266  ;;  %2286 = vtanh.f32 %v1252_v34  ;;  %v1256_v31 = vadd.f32 %v1255_v57, %v3254_v48  ;;  %v1368_v8 = vpop.f32.mrb[18].mxu1  ;;  %v1998_v15 = vpack.c.bf16 %v2265_v18, %v2257_v19 }
 0x1e3   : > { %v1257_v16 = vpop.f32.mrb[19].mxu0  ;;  %v2269_v42 = vpop.eup %2268  ;;  %2288 = vtanh.f32 %v1365_v24  ;;  %v1369_v60 = vadd.f32 %v1368_v8, %v3254_v48  ;;  %1983 = vmatprep.subr.bf16.mxu0 %v1982_v17 }
 0x1e4   : > { %v1258_v43 = vadd.f32 %v1257_v16, %v3254_v48  ;;  %v1370_v35 = vpop.f32.mrb[19].mxu1  ;;  %v2271_v38 = vpop.eup %2270  ;;  %2290 = vtanh.f32 %v1256_v31  ;;  %1999 = vmatprep.subr.bf16.mxu1 %v1998_v15  ;;  %1985 = vmatpush1.bf16.msra.mxu0 %v1984_v11 }
 0x1e5   : > { %v1371_v44 = vadd.f32 %v1370_v35, %v3254_v48  ;;  %v2273_v5 = vpop.eup %2272  ;;  %2292 = vtanh.f32 %v1369_v60  ;;  %2001 = vmatpush1.bf16.msra.mxu1 %v2000_v25  ;;  %v1261_v10 = vpop.f32.mrb[20].mxu0 }
 0x1e6   : > { %v2275_v13 = vpop.eup %2274  ;;  %2294 = vtanh.f32 %v1258_v43  ;;  %v1262_v56 = vadd.f32 %v1261_v10, %v3260_v40  ;;  %v1374_v51 = vpop.f32.mrb[20].mxu1 }
 0x1e7   : > { %v1263_v63 = vpop.f32.mrb[21].mxu0  ;;  %v2277_v59 = vpop.eup %2276  ;;  %2296 = vtanh.f32 %v1371_v44  ;;  %v1375_v29 = vadd.f32 %v1374_v51, %v3260_v40  ;;  %v1988_v48 = vpack.c.bf16 %v2275_v13, %v2267_v33 }
 0x1e8   : > { %v1264_v45 = vadd.f32 %v1263_v63, %v3260_v40  ;;  %v1376_v30 = vpop.f32.mrb[21].mxu1  ;;  %v2279_v39 = vpop.eup %2278  ;;  %2298 = vtanh.f32 %v1262_v56  ;;  %v2004_v6 = vpack.c.bf16 %v2277_v59, %v2269_v42 }
 0x1e9   : > { %v1377_v49 = vadd.f32 %v1376_v30, %v3260_v40  ;;  %v2281_v53 = vpop.eup %2280  ;;  %2300 = vtanh.f32 %v1375_v29  ;;  %v1267_v3 = vpop.f32.mrb[22].mxu0  ;;  %v1986_v12 = vpack.c.bf16 %v2279_v39, %v2271_v38 }
 0x1ea   : > { %v2283_v28 = vpop.eup %2282  ;;  %2302 = vtanh.f32 %v1264_v45  ;;  %v1268_v0 = vadd.f32 %v1267_v3, %v3266_v54  ;;  %v1380_v58 = vpop.f32.mrb[22].mxu1  ;;  %v2002_v41 = vpack.c.bf16 %v2281_v53, %v2273_v5 }
 0x1eb   : > { %v1269_v4 = vpop.f32.mrb[23].mxu0  ;;  %v2285_v36 = vpop.eup %2284  ;;  %2304 = vtanh.f32 %v1377_v49  ;;  %v1381_v62 = vadd.f32 %v1380_v58, %v3266_v54  ;;  %1987 = vmatprep.subr.bf16.mxu0 %v1986_v12 }
 0x1ec   : > { %v1270_v14 = vadd.f32 %v1269_v4, %v3266_v54  ;;  %v1382_v47 = vpop.f32.mrb[23].mxu1  ;;  %v2287_v40 = vpop.eup %2286  ;;  %2306 = vtanh.f32 %v1268_v0  ;;  %2003 = vmatprep.subr.bf16.mxu1 %v2002_v41  ;;  %1989 = vmatpush1.bf16.msra.mxu0 %v1988_v48 }
 0x1ed   : > { %v1383_v9 = vadd.f32 %v1382_v47, %v3266_v54  ;;  %v2289_v1 = vpop.eup %2288  ;;  %2308 = vtanh.f32 %v1381_v62  ;;  %2005 = vmatpush1.bf16.msra.mxu1 %v2004_v6  ;;  %v1273_v19 = vpop.f32.mrb[24].mxu0 }
 0x1ee   : > { %v2291_v22 = vpop.eup %2290  ;;  %2310 = vtanh.f32 %v1270_v14  ;;  %v1274_v55 = vadd.f32 %v1273_v19, %v3272_v2  ;;  %v1386_v27 = vpop.f32.mrb[24].mxu1 }
 0x1ef   : > { %v1275_v46 = vpop.f32.mrb[25].mxu0  ;;  %v2293_v7 = vpop.eup %2292  ;;  %2312 = vtanh.f32 %v1383_v9  ;;  %v1387_v54 = vadd.f32 %v1386_v27, %v3272_v2  ;;  %1900 = vmatmul.mubr.msk.f32.vlgmr.msra.gmra.mrb[32].mxu0 %vm932_vm0, %v3315_v50  ;;  %v2008_v34 = vpack.c.bf16 %v2291_v22, %v2283_v28 }
 0x1f0   : > { %v1276_v32 = vadd.f32 %v1275_v46, %v3272_v2  ;;  %v1388_v23 = vpop.f32.mrb[25].mxu1  ;;  %v2295_v52 = vpop.eup %2294  ;;  %2314 = vtanh.f32 %v1274_v55  ;;  %1901 = vmatmul.mubr.msk.f32.vlgmr.msra.gmra.mrb[32].mxu1 %vm932_vm0, %v3315_v50  ;;  %v2024_v37 = vpack.c.bf16 %v2293_v7, %v2285_v36  ;;  %1689 = vmatprep.mubr.f32.mxu0 %v3489_v20 }
 0x1f1   : > { %v1389_v11 = vadd.f32 %v1388_v23, %v3272_v2  ;;  %v2297_v24 = vpop.eup %2296  ;;  %2316 = vtanh.f32 %v1387_v54  ;;  %v1279_v25 = vpop.f32.mrb[26].mxu0  ;;  %v2006_v18 = vpack.c.bf16 %v2295_v52, %v2287_v40  ;;  %1760 = vmatprep.mubr.f32.mxu1 %v3489_v20 }
 0x1f2   : > { %v2299_v57 = vpop.eup %2298  ;;  %2318 = vtanh.f32 %v1276_v32  ;;  %v1280_v17 = vadd.f32 %v1279_v25, %v3278_v26  ;;  %v1392_v33 = vpop.f32.mrb[26].mxu1  ;;  %v2022_v8 = vpack.c.bf16 %v2297_v24, %v2289_v1 }
 0x1f3   : > { %v1281_v31 = vpop.f32.mrb[27].mxu0  ;;  %v2301_v2 = vpop.eup %2300  ;;  %2320 = vtanh.f32 %v1389_v11  ;;  %v1393_v16 = vadd.f32 %v1392_v33, %v3278_v26  ;;  %2007 = vmatprep.subr.bf16.mxu0 %v2006_v18 }
 0x1f4   : > { %v1282_v15 = vadd.f32 %v1281_v31, %v3278_v26  ;;  %v1394_v42 = vpop.f32.mrb[27].mxu1  ;;  %v2303_v60 = vpop.eup %2302  ;;  %2322 = vtanh.f32 %v1280_v17  ;;  %2023 = vmatprep.subr.bf16.mxu1 %v2022_v8  ;;  %2009 = vmatpush1.bf16.msra.mxu0 %v2008_v34 }
 0x1f5   : > { %v1395_v43 = vadd.f32 %v1394_v42, %v3278_v26  ;;  %v2305_v20 = vpop.eup %2304  ;;  %2324 = vtanh.f32 %v1393_v16  ;;  %2025 = vmatpush1.bf16.msra.mxu1 %v2024_v37  ;;  %v1285_v35 = vpop.f32.mrb[28].mxu0 }
 0x1f6   : > { %v2307_v38 = vpop.eup %2306  ;;  %2326 = vtanh.f32 %v1282_v15  ;;  %v1286_v44 = vadd.f32 %v1285_v35, %v3284_v21  ;;  %v1398_v5 = vpop.f32.mrb[28].mxu1 }
 0x1f7   : > { %v1287_v10 = vpop.f32.mrb[29].mxu0  ;;  %v2309_v13 = vpop.eup %2308  ;;  %2328 = vtanh.f32 %v1395_v43  ;;  %v1399_v56 = vadd.f32 %v1398_v5, %v3284_v21  ;;  %v2012_v26 = vpack.c.bf16 %v2307_v38, %v2299_v57 }
 0x1f8   : > { %v1288_v51 = vadd.f32 %v1287_v10, %v3284_v21  ;;  %v1400_v63 = vpop.f32.mrb[29].mxu1  ;;  %v2311_v59 = vpop.eup %2310  ;;  %2330 = vtanh.f32 %v1286_v44  ;;  %v2028_v45 = vpack.c.bf16 %v2309_v13, %v2301_v2 }
 0x1f9   : > { %v1401_v29 = vadd.f32 %v1400_v63, %v3284_v21  ;;  %v2313_v30 = vpop.eup %2312  ;;  %2332 = vtanh.f32 %v1399_v56  ;;  %v1291_v48 = vpop.f32.mrb[30].mxu0  ;;  %v2010_v39 = vpack.c.bf16 %v2311_v59, %v2303_v60 }
 0x1fa   : > { %v2315_v49 = vpop.eup %2314  ;;  %2334 = vtanh.f32 %v1288_v51  ;;  %v1292_v6 = vadd.f32 %v1291_v48, %v3290_v61  ;;  %v1404_v53 = vpop.f32.mrb[30].mxu1  ;;  %v2026_v12 = vpack.c.bf16 %v2313_v30, %v2305_v20 }
 0x1fb   : > { %v1293_v3 = vpop.f32.mrb[31].mxu0  ;;  %v2317_v28 = vpop.eup %2316  ;;  %2336 = vtanh.f32 %v1401_v29  ;;  %v1405_v0 = vadd.f32 %v1404_v53, %v3290_v61  ;;  %2011 = vmatprep.subr.bf16.mxu0 %v2010_v39 }
 0x1fc   : > { %v1294_v58 = vadd.f32 %v1293_v3, %v3290_v61  ;;  %v1406_v4 = vpop.f32.mrb[31].mxu1  ;;  %v2319_v21 = vpop.eup %2318  ;;  %2338 = vtanh.f32 %v1292_v6  ;;  %2027 = vmatprep.subr.bf16.mxu1 %v2026_v12  ;;  %2013 = vmatpush1.bf16.msra.mxu0 %v2012_v26 }
 0x1fd   : > { %v1407_v41 = vadd.f32 %v1406_v4, %v3290_v61  ;;  %v2321_v36 = vpop.eup %2320  ;;  %2340 = vtanh.f32 %v1405_v0  ;;  %2029 = vmatpush1.bf16.msra.mxu1 %v2028_v45  ;;  %v1478_v24 = vpop.permute.xlu0 %1477 }
 0x1fe   : > { %v2323_v62 = vpop.eup %2322  ;;  %2342 = vtanh.f32 %v1294_v58 }
 0x1ff   : > { %v2325_v14 = vpop.eup %2324  ;;  %2344 = vtanh.f32 %v1407_v41  ;;  %v2016_v47 = vpack.c.bf16 %v2323_v62, %v2315_v49 }
 0x200   : > { %v2327_v40 = vpop.eup %2326  ;;  %v2032_v9 = vpack.c.bf16 %v2325_v14, %v2317_v28 }
 0x201   : > { %v2329_v1 = vpop.eup %2328  ;;  %v2014_v19 = vpack.c.bf16 %v2327_v40, %v2319_v21 }
 0x202   : > { %v2331_v22 = vpop.eup %2330  ;;  %v2030_v55 = vpack.c.bf16 %v2329_v1, %v2321_v36 }
 0x203   : > { %v2333_v27 = vpop.eup %2332  ;;  %2015 = vmatprep.subr.bf16.mxu0 %v2014_v19 }
 0x204   : > { %v2335_v46 = vpop.eup %2334  ;;  %2031 = vmatprep.subr.bf16.mxu1 %v2030_v55  ;;  %2017 = vmatpush1.bf16.msra.mxu0 %v2016_v47 }
 0x205   : > { %v2337_v61 = vpop.eup %2336  ;;  %2033 = vmatpush1.bf16.msra.mxu1 %v2032_v9 }
 0x206   : > { %v2339_v7 = vpop.eup %2338 }
 0x207   : > { %v2341_v54 = vpop.eup %2340  ;;  %v2020_v32 = vpack.c.bf16 %v2339_v7, %v2331_v22 }
 0x208   : > { %v2343_v23 = vpop.eup %2342  ;;  %v2036_v34 = vpack.c.bf16 %v2341_v54, %v2333_v27 }
 0x209   : > { %v2345_v52 = vpop.eup %2344  ;;  %v2018_v11 = vpack.c.bf16 %v2343_v23, %v2335_v46 }
 0x20a   : > { %v2034_v37 = vpack.c.bf16 %v2345_v52, %v2337_v61 }
 0x20b   : > { %2019 = vmatprep.subr.bf16.mxu0 %v2018_v11 }
 0x20c   : > { %2035 = vmatprep.subr.bf16.mxu1 %v2034_v37  ;;  %2021 = vmatpush1.bf16.msra.mxu0 %v2020_v32 }
 0x20d   : > { %2037 = vmatpush1.bf16.msra.mxu1 %v2036_v34 }
 0x20f   : > { %1902 = vmatmul.mubr.msk.f32.vlgmr.msra.gmra.mrb[34].mxu0 %vm932_vm0, %v3315_v50 }
 0x210   : > { %1903 = vmatmul.mubr.msk.f32.vlgmr.msra.gmra.mrb[34].mxu1 %vm932_vm0, %v3315_v50 }
 0x2c2   : > { %v1549_v25 = vpop.f32.mrb[32].mxu0 }
 0x2c3   : > { %v1550_v18 = vadd.f32 %v1549_v25, %v1478_v24  ;;  %v1620_v57 = vpop.f32.mrb[32].mxu1  ;;  %v1551_v17 = vpop.f32.mrb[33].mxu0 }
 0x2c4   : > { %v1621_v33 = vadd.f32 %v1620_v57, %v1478_v24  ;;  %v1552_v31 = vadd.f32 %v1551_v17, %v1478_v24  ;;  %v1622_v8 = vpop.f32.mrb[33].mxu1 }
 0x2c5   : > { %v1623_v2 = vadd.f32 %v1622_v8, %v1478_v24 }
 0x2c6   : > { %v1775_v16 = vcombine.low %v1550_v18, %v1552_v31 }
 0x2c7   : > { %v1776_v15 = vcombine.low %v1621_v33, %v1623_v2 }
 0x2c8   : > { %1783 = vst [vmem:[%s272_s18] sm:$0xff] %v1775_v16 }
 0x2c9   : > { %1784 = vst [vmem:[%s272_s18 + $0x8] sm:$0xff] %v1776_v15 }
 0x2e2   : > { %v1691_v42 = vpop.f32.mrb[34].mxu0 }
 0x2e3   : > { %v1692_v50 = vadd.f32 %v1691_v42, %v1478_v24  ;;  %v1762_v60 = vpop.f32.mrb[34].mxu1  ;;  %v1693_v43 = vpop.f32.mrb[35].mxu0 }
 0x2e4   : > { %v1763_v20 = vadd.f32 %v1762_v60, %v1478_v24  ;;  %v1694_v35 = vadd.f32 %v1693_v43, %v1478_v24  ;;  %v1764_v38 = vpop.f32.mrb[35].mxu1 }
 0x2e5   : > { %v1765_v44 = vadd.f32 %v1764_v38, %v1478_v24 }
 0x2e6   : > { %v1777_v5 = vcombine.low %v1692_v50, %v1694_v35 }
 0x2e7   : > { %v1778_v10 = vcombine.low %v1763_v20, %v1765_v44 }
 0x2e8   : > { %1785 = vst [vmem:[%s272_s18 + $0x10] sm:$0xff] %v1777_v5 }
 0x2e9   : > { %1786 = vst [vmem:[%s272_s18 + $0x18] sm:$0xff] %v1778_v10 }
 0x2ea   : > { %2359 = shalt.err (!%p2356_p3)
}
 0x2eb   : > { %s2360_s14 = scalar_lea.hbm %s3350_s23, 512  ;;  %s2364_s17 = scalar_lea.hbm %s3401_s7, 1024 }
 0x2ec   : > { %p2361_p4 = scmp.ne.s32.totalorder %s3350_s23, %s2360_s14  ;;  %p2365_p9 = scmp.lt.u32.totalorder %s3350_s23, %s3401_s7 }
 0x2ed   : > { %p2366_p10 = scmp.lt.u32.totalorder %s2364_s17, %s2360_s14  ;;  %p2368_p12 = scmp.lt.u32.totalorder %s2360_s14, %s3350_s23 }
 0x2ee   : > { %p2362_p7 = pnand %p2361_p4, %p2492_p5 }
 0x2ef   : > { %p2367_p11 = por %p2366_p10, %p2365_p9 }
 0x2f0   : > { %p2363_p8 = pneg %p2362_p7 }
 0x2f1   : > { %p2369_p13 = por %p2368_p12, %p2367_p11 }
 0x2f3   : > { %p2370_p0 = pnand %p2369_p13, %p2363_p8 }
 0x2f5   : > { %2373 = shalt.err (!%p2370_p0)
}
 0x2f6   : > { %2038 = dma.vmem_to_hbm [thread:$0]  (%p2492_p5), %s3352_s20, 512, %s3350_s23, %s1788_s29  }
 0x2f7 PF: > { %p2044_p1 = scmp.ge.s32.totalorder %s2408_s27, 2  ;;  %s1814_s21 = sand.u32 1, %s2396_s24  }
 0x2f8   : > { %s1815_s22 = scalar_lea.sflag [#allocation3], %s1814_s21 }
 0x2f9   : > { %p2041_p2 = pnand %p2044_p1, %p2496_p6 }
 0x2fb   : > { %2391 = dma.done.wait (!%p2041_p2), %s1815_s22, 512  }
 0x2fc   : > { %2393 = vsyncadd (!%p2041_p2), %s1815_s22, 4294966784  ;;  %p17_p3 = scmp.ge.s32.totalorder %s2479_s30, 4   ;;  %s3491_s24 = smov %s2400_s25 }
 0x2fd   : > { %s3492_s25 = smov %s2404_s26  ;;  %s3493_s26 = smov %s2490_s10 }
 0x2fe   : > { %s3494_s27 = smov %s2479_s30  ;;  %19 = sbr.rel (!%p17_p3) target bundleno = 3 (0x3), region = 83 }
 0x305   :  { %1820 = vsyncpa [#allocation3], 1 }
 0x306   :  { %1822 = vsyncpa [#allocation3 + $0x1], 1 }

</bundles_post_ra>
